<compile_context>
chip_gen: v7x
topology: tpu7x:2x2x1
jax: 0.10.0
libtpu: 0.0.40
codegen_flags: <defaults>
</compile_context>

<pallas_src>
import jax
import jax.numpy as jnp
from jax.experimental import pallas as pl
from jax.experimental.pallas import tpu as pltpu

EPS = 1e-5


def _bn_add_kernel(x_ref, skip_ref, wb_ref, o_ref):
    # x_ref, skip_ref, o_ref: (N, TC, HW)   wb_ref: (C, 2), resident in VMEM.
    n, tc, hw = x_ref.shape
    x = x_ref[...].astype(jnp.float32)

    inv_l = 1.0 / (n * hw)                                   # compile-time constant
    mean = jnp.sum(x, axis=(0, 2), keepdims=True) * inv_l    # (1, TC, 1)
    xc = x - mean
    var = jnp.sum(xc * xc, axis=(0, 2), keepdims=True) * inv_l
    inv_std = jax.lax.rsqrt(var + EPS)

    # Slice this block's (tc, 2) window out of the resident weight/bias slab.
    off = pl.multiple_of(pl.program_id(0) * tc, 8)
    wb = wb_ref[pl.ds(off, tc), :]                           # (TC, 2)
    w = wb[:, 0:1].reshape(1, tc, 1)                         # (1, TC, 1)
    b = wb[:, 1:2].reshape(1, tc, 1)                         # (1, TC, 1)

    skip = skip_ref[...].astype(jnp.float32)
    o_ref[...] = (skip + xc * (w * inv_std) + b).astype(o_ref.dtype)


def _choose_channel_tile(C, max_tc=224):
    """Largest divisor of C that is a multiple of 8 and <= max_tc, preferring
    one that yields an even number of blocks (balanced v7x 2-TC split)."""
    best = None
    for tc in range(min(max_tc, C), 7, -1):
        if C % tc == 0 and tc % 8 == 0:
            if best is None:
                best = tc
            if (C // tc) % 2 == 0:
                return tc
    return best if best is not None else C   # fallback: single whole-C block


def batchnorm_add(x230, x217, weight, bias, *, max_tc=224):
    """x231 = BatchNorm2d(x230) (training stats); return x217 + x231."""
    N, C, H, W = x230.shape
    HW = H * W

    # Free reshapes: NCHW -> (N, C, H*W).  No HBM transpose for any N.
    x_bn = x230.reshape(N, C, HW)
    x_skip = x217.reshape(N, C, HW)

    # One fused f32 slab for weight/bias -> single DMA, kept resident.
    wb = jnp.stack(
        [weight.astype(jnp.float32), bias.astype(jnp.float32)], axis=1
    )  # (C, 2)

    tc = _choose_channel_tile(C, max_tc)
    grid = (C // tc,)

    itemsize = jnp.dtype(x230.dtype).itemsize
    cost = pl.CostEstimate(
        flops=7 * N * C * HW,                 # mean, center, square, var-sum, scale, shift, residual
        transcendentals=C,                    # rsqrt per channel
        bytes_accessed=3 * N * C * HW * itemsize + 2 * C * 4,
    )

    out = pl.pallas_call(
        _bn_add_kernel,
        out_shape=jax.ShapeDtypeStruct((N, C, HW), x230.dtype),
        grid=grid,
        in_specs=[
            pl.BlockSpec((N, tc, HW), lambda i: (0, i, 0)),
            pl.BlockSpec((N, tc, HW), lambda i: (0, i, 0)),
            pl.BlockSpec((C, 2), lambda i: (0, 0)),   # constant block -> resident
        ],
        out_specs=pl.BlockSpec((N, tc, HW), lambda i: (0, i, 0)),
        compiler_params=pltpu.CompilerParams(
            dimension_semantics=("parallel",),
        ),
        cost_estimate=cost,
    )(x_bn, x_skip, wb)

    return out.reshape(N, C, H, W)


def _reference(x230, x217, weight, bias):
    mean = jnp.mean(x230, axis=(0, 2, 3), keepdims=True)
    var = jnp.mean((x230 - mean) ** 2, axis=(0, 2, 3), keepdims=True)
    y = (x230 - mean) * jax.lax.rsqrt(var + EPS)
    y = y * weight.reshape(1, -1, 1, 1) + bias.reshape(1, -1, 1, 1)
    return x217 + y


if __name__ == "__main__":
    key = jax.random.PRNGKey(0)
    k1, k2, k3, k4 = jax.random.split(key, 4)

    # Shapes implied by the module: BatchNorm2d(896) on (1, 896, 14, 14).
    N, C, H, W = 1, 896, 14, 14
    x230 = jax.random.normal(k1, (N, C, H, W), dtype=jnp.float32)
    x217 = jax.random.normal(k2, (N, C, H, W), dtype=jnp.float32)

    # Torch default affine init is (1, 0); perturb slightly so the affine path
    # is actually exercised.
    weight = 1.0 + 0.1 * jax.random.normal(k3, (C,), dtype=jnp.float32)
    bias = 0.1 * jax.random.normal(k4, (C,), dtype=jnp.float32)

    out = batchnorm_add(x230, x217, weight, bias)
    out = jax.block_until_ready(out)

    ref = _reference(x230, x217, weight, bias)
    assert out.shape == (N, C, H, W)
    assert jnp.allclose(out, ref, atol=1e-4, rtol=1e-4), "mismatch vs reference"

    print("KERNEL_OK")
</pallas_src>

<mosaic_0001>
module attributes {stable_mosaic.version = 11 : i64} {
  func.func @_bn_add_kernel(%arg0: i32, %arg1: memref<1x224x196xf32, #tpu.memory_space<vmem>>, %arg2: memref<1x224x196xf32, #tpu.memory_space<vmem>>, %arg3: memref<896x2xf32, #tpu.memory_space<vmem>>, %arg4: memref<1x224x196xf32, #tpu.memory_space<vmem>>) attributes {dimension_semantics = [#tpu.dimension_semantics<parallel>], iteration_bounds = array<i64: 4>, scalar_prefetch = 0 : i64, scratch_operands = 0 : i64, tpu.core_type = #tpu.core_type<tc>, window_params = [{transform_indices = @transform_0, window_bounds = array<i64: 1, 224, 196>}, {transform_indices = @transform_1, window_bounds = array<i64: 1, 224, 196>}, {pipeline_mode = #tpu.pipeline_mode<synchronous>, transform_indices = @transform_2, window_bounds = array<i64: 896, 2>}, {transform_indices = @transform_3, window_bounds = array<i64: 1, 224, 196>}]} {
    %c0 = arith.constant 0 : index
    %c0_0 = arith.constant 0 : index
    %c0_1 = arith.constant 0 : index
    %0 = vector.load %arg1[%c0, %c0_0, %c0_1] : memref<1x224x196xf32, #tpu.memory_space<vmem>>, vector<1x224x196xf32>
    %cst = arith.constant dense<0.000000e+00> : vector<224xf32>
    %1 = vector.multi_reduction <add>, %0, %cst [0, 2] : vector<1x224x196xf32> to vector<224xf32>
    %2 = vector.shape_cast %1 : vector<224xf32> to vector<1x224x1xf32>
    %cst_2 = arith.constant 0.00510204071 : f32
    %3 = vector.broadcast %cst_2 : f32 to vector<1x224x1xf32>
    %4 = arith.mulf %2, %3 : vector<1x224x1xf32>
    %5 = vector.broadcast %4 : vector<1x224x1xf32> to vector<1x224x196xf32>
    %6 = arith.subf %0, %5 : vector<1x224x196xf32>
    %7 = arith.mulf %6, %6 : vector<1x224x196xf32>
    %cst_3 = arith.constant dense<0.000000e+00> : vector<224xf32>
    %8 = vector.multi_reduction <add>, %7, %cst_3 [0, 2] : vector<1x224x196xf32> to vector<224xf32>
    %9 = vector.shape_cast %8 : vector<224xf32> to vector<1x224x1xf32>
    %cst_4 = arith.constant 0.00510204071 : f32
    %10 = vector.broadcast %cst_4 : f32 to vector<1x224x1xf32>
    %11 = arith.mulf %9, %10 : vector<1x224x1xf32>
    %cst_5 = arith.constant 9.99999974E-6 : f32
    %12 = vector.broadcast %cst_5 : f32 to vector<1x224x1xf32>
    %13 = arith.addf %11, %12 : vector<1x224x1xf32>
    %14 = math.rsqrt %13 : vector<1x224x1xf32>
    %c224_i32 = arith.constant 224 : i32
    %15 = arith.muli %arg0, %c224_i32 : i32
    %16 = tpu.assume_multiple %15, 8 : i32
    %17 = arith.index_cast %16 : i32 to index
    %c0_6 = arith.constant 0 : index
    %18 = vector.load %arg3[%17, %c0_6] : memref<896x2xf32, #tpu.memory_space<vmem>>, vector<224x2xf32>
    %19 = vector.extract_strided_slice %18 {offsets = [0, 0], sizes = [224, 1], strides = [1, 1]} : vector<224x2xf32> to vector<224x1xf32>
    %20 = vector.shape_cast %19 : vector<224x1xf32> to vector<1x224x1xf32>
    %21 = vector.extract_strided_slice %18 {offsets = [0, 1], sizes = [224, 1], strides = [1, 1]} : vector<224x2xf32> to vector<224x1xf32>
    %22 = vector.shape_cast %21 : vector<224x1xf32> to vector<1x224x1xf32>
    %c0_7 = arith.constant 0 : index
    %c0_8 = arith.constant 0 : index
    %c0_9 = arith.constant 0 : index
    %23 = vector.load %arg2[%c0_7, %c0_8, %c0_9] : memref<1x224x196xf32, #tpu.memory_space<vmem>>, vector<1x224x196xf32>
    %24 = arith.mulf %20, %14 : vector<1x224x1xf32>
    %25 = vector.broadcast %24 : vector<1x224x1xf32> to vector<1x224x196xf32>
    %26 = arith.mulf %6, %25 : vector<1x224x196xf32>
    %27 = arith.addf %23, %26 : vector<1x224x196xf32>
    %28 = vector.broadcast %22 : vector<1x224x1xf32> to vector<1x224x196xf32>
    %29 = arith.addf %27, %28 : vector<1x224x196xf32>
    %c0_10 = arith.constant 0 : index
    %c0_11 = arith.constant 0 : index
    %c0_12 = arith.constant 0 : index
    %30 = vector.load %arg4[%c0_10, %c0_11, %c0_12] : memref<1x224x196xf32, #tpu.memory_space<vmem>>, vector<1x224x196xf32>
    tpu.vector_store %arg4[%c0_10, %c0_11, %c0_12], %29 {strides = array<i32>} : memref<1x224x196xf32, #tpu.memory_space<vmem>>, vector<1x224x196xf32>,
    return
  }
  func.func @transform_0(%arg0: i32) -> (i32, i32, i32) {
    %c0_i32 = arith.constant 0 : i32
    %c0_i32_0 = arith.constant 0 : i32
    %c0_i32_1 = arith.constant 0 : i32
    return %c0_i32, %arg0, %c0_i32_0 : i32, i32, i32
  }
  func.func @transform_1(%arg0: i32) -> (i32, i32, i32) {
    %c0_i32 = arith.constant 0 : i32
    %c0_i32_0 = arith.constant 0 : i32
    %c0_i32_1 = arith.constant 0 : i32
    return %c0_i32, %arg0, %c0_i32_0 : i32, i32, i32
  }
  func.func @transform_2(%arg0: i32) -> (i32, i32) {
    %c0_i32 = arith.constant 0 : i32
    %c0_i32_0 = arith.constant 0 : i32
    %c0_i32_1 = arith.constant 0 : i32
    return %c0_i32, %c0_i32_0 : i32, i32
  }
  func.func @transform_3(%arg0: i32) -> (i32, i32, i32) {
    %c0_i32 = arith.constant 0 : i32
    %c0_i32_0 = arith.constant 0 : i32
    %c0_i32_1 = arith.constant 0 : i32
    return %c0_i32, %arg0, %c0_i32_0 : i32, i32, i32
  }
}

</mosaic_0001>

<bundles_post_ra>
// kernel: tpu_custom_call.1
= control target key start
LH: loop header
LB: loop body
LE: loop exit
PB: predicated region body
PF: predicated region fallthrough
CT: control target
= control target key end

     0   :  { %s1517_s12 = smov 0   ;;  %s2553_s0 = inlined_call_operand.vmem [shape: f32[1,896,196], index: 0, kind: input, shape index: {}]   ;;  %s2554_s1 = inlined_call_operand.vmem [shape: f32[1,896,196], index: 1, kind: input, shape index: {}]   ;;  %s2555_s2 = inlined_call_operand.vmem [shape: f32[896,2], index: 2, kind: input, shape index: {}]   ;;  %s2556_s3 = inlined_call_operand.vmem [shape: f32[1,896,196], index: 3, kind: output, shape index: {}]  }
   0x1 LB: > { %s1399_s13 = sadd.s32 4294967295, %s1493_s12   ;;  %p1403_p0 = scmp.ge.s32.totalorder %s1493_s12, 1  ;;  %s1493_s12 = sphi %s1517_s12, %s13_s12  }
   0x2   : > { %p151_p1 = scmp.lt.s32.totalorder %s1493_s12, 5 }
   0x4   : > { %p152_p2 = pnand %p1403_p0, %p151_p1 }
   0x6   : > { %155 = sbr.rel (%p152_p2) target bundleno = 580 (0x244), region = 32 }
   0xd   : > { %s183_s14 = smul.u32 28, %s1399_s13  ;;  %v2557_v0 = vmov 1   ;;  %vm260_vm0 = vcmask 556032  }
   0xe   : > { %1425 = vset.pattern.permute.xlu1 %v2557_v0  ;;  %1426 = vset.pattern.permute.xlu0 %v2557_v0  ;;  %s709_s19 = smul.u32 224, %s1399_s13 }
   0xf   : > { %p184_p3 = scmp.lt.s32.totalorder %s183_s14, 111 }
  0x10   : > { %s1794_s22 = scalar_lea.vmem %s2555_s2, %s709_s19 }
  0x11   : > { %s2759_s14 = smov (!%p184_p3, %s183_s14), 111 }
  0x12   : > { %s1529_s15 = sshll.u32 %s2759_s14, 4 }
  0x13   : > { %s1535_s18 = scalar_lea.vmem %s2553_s0, %s1529_s15  ;;  %s2292_s25 = scalar_lea.vmem %s2554_s1, %s1529_s15 }
  0x14   : > { %v1538_v1 = vld [vmem:[%s1535_s18 + $0x20] sm:$0xff]  ;;  %v1541_v2 = vld [vmem:[%s1535_s18 + $0x28] sm:$0xff]  ;;  %v1552_v6 = vld [vmem:[%s1535_s18 + $0x30] sm:$0xff]  ;;  %s2304_s28 = scalar_lea.vmem %s2556_s3, %s1529_s15 }
  0x15   : > { %v1544_v3 = vld [vmem:[%s1535_s18] sm:$0xff]  ;;  %v269_v4 = vsel %vm260_vm0, %v1541_v2, 0.0  ;;  %v1549_v5 = vld [vmem:[%s1535_s18 + $0x8] sm:$0xff]  ;;  %v1555_v7 = vld [vmem:[%s1535_s18 + $0x38] sm:$0xff] }
  0x16   : > { %v270_v8 = vadd.f32 %v269_v4, %v1538_v1  ;;  %v261_v9 = vsel %vm260_vm0, %v1549_v5, 0.0  ;;  %v273_v10 = vsel %vm260_vm0, %v1555_v7, 0.0  ;;  %v1563_v11 = vld [vmem:[%s1535_s18 + $0x10] sm:$0xff]  ;;  %v1566_v12 = vld [vmem:[%s1535_s18 + $0x18] sm:$0xff]  ;;  %v1575_v16 = vld [vmem:[%s1535_s18 + $0x48] sm:$0xff] }
  0x17   : > { %v262_v13 = vadd.f32 %v261_v9, %v1544_v3  ;;  %v265_v14 = vsel %vm260_vm0, %v1566_v12, 0.0  ;;  %v1572_v15 = vld [vmem:[%s1535_s18 + $0x58] sm:$0xff]  ;;  %v274_v17 = vadd.f32 %v273_v10, %v1552_v6  ;;  %v1580_v19 = vld [vmem:[%s1535_s18 + $0x50] sm:$0xff]  ;;  %v1585_v21 = vld [vmem:[%s1535_s18 + $0x40] sm:$0xff]  ;;  %v277_v22 = vsel %vm260_vm0, %v1575_v16, 0.0 }
  0x18   : > { %271 = vadd.xlane.f32.xlu1 %v270_v8  ;;  %v266_v18 = vadd.f32 %v265_v14, %v1563_v11  ;;  %v281_v20 = vsel %vm260_vm0, %v1572_v15, 0.0  ;;  %v1590_v23 = vld [vmem:[%s1535_s18 + $0x78] sm:$0xff]  ;;  %v1593_v24 = vld [vmem:[%s1535_s18 + $0x68] sm:$0xff]  ;;  %v278_v26 = vadd.f32 %v277_v22, %v1585_v21  ;;  %v1598_v27 = vld [vmem:[%s1535_s18 + $0x70] sm:$0xff] }
  0x19   : > { %263 = vadd.xlane.f32.xlu0 %v262_v13  ;;  %v282_v25 = vadd.f32 %v281_v20, %v1580_v19  ;;  %v289_v28 = vsel %vm260_vm0, %v1590_v23, 0.0  ;;  %v1603_v29 = vld [vmem:[%s1535_s18 + $0x60] sm:$0xff]  ;;  %v285_v30 = vsel %vm260_vm0, %v1593_v24, 0.0  ;;  %v1608_v31 = vld [vmem:[%s1535_s18 + $0x98] sm:$0xff]  ;;  %v1611_v32 = vld [vmem:[%s1535_s18 + $0x88] sm:$0xff] }
  0x1a   : > { %v290_v33 = vadd.f32 %v289_v28, %v1598_v27  ;;  %v286_v34 = vadd.f32 %v285_v30, %v1603_v29  ;;  %v1616_v35 = vld [vmem:[%s1535_s18 + $0x90] sm:$0xff]  ;;  %v297_v36 = vsel %vm260_vm0, %v1608_v31, 0.0  ;;  %v1621_v37 = vld [vmem:[%s1535_s18 + $0x80] sm:$0xff]  ;;  %v293_v38 = vsel %vm260_vm0, %v1611_v32, 0.0  ;;  %v1626_v39 = vld [vmem:[%s1535_s18 + $0xb8] sm:$0xff] }
  0x1b   : > { %v1629_v40 = vld [vmem:[%s1535_s18 + $0xa8] sm:$0xff]  ;;  %v298_v41 = vadd.f32 %v297_v36, %v1616_v35  ;;  %v294_v42 = vadd.f32 %v293_v38, %v1621_v37  ;;  %v1634_v43 = vld [vmem:[%s1535_s18 + $0xb0] sm:$0xff]  ;;  %v305_v44 = vsel %vm260_vm0, %v1626_v39, 0.0  ;;  %v1639_v45 = vld [vmem:[%s1535_s18 + $0xa0] sm:$0xff] }
  0x1c   : > { %275 = vadd.xlane.f32.xlu1 %v274_v17  ;;  %v301_v46 = vsel %vm260_vm0, %v1629_v40, 0.0  ;;  %v1644_v47 = vld [vmem:[%s1535_s18 + $0xd8] sm:$0xff]  ;;  %v1647_v48 = vld [vmem:[%s1535_s18 + $0xc8] sm:$0xff]  ;;  %v306_v49 = vadd.f32 %v305_v44, %v1634_v43  ;;  %v1652_v51 = vld [vmem:[%s1535_s18 + $0xd0] sm:$0xff] }
  0x1d   : > { %267 = vadd.xlane.f32.xlu0 %v266_v18  ;;  %v302_v50 = vadd.f32 %v301_v46, %v1639_v45  ;;  %v313_v52 = vsel %vm260_vm0, %v1644_v47, 0.0  ;;  %v1657_v53 = vld [vmem:[%s1535_s18 + $0xc0] sm:$0xff]  ;;  %v309_v54 = vsel %vm260_vm0, %v1647_v48, 0.0  ;;  %v1662_v55 = vld [vmem:[%s1535_s18 + $0xf8] sm:$0xff]  ;;  %v1665_v56 = vld [vmem:[%s1535_s18 + $0xe8] sm:$0xff] }
  0x1e   : > { %v314_v57 = vadd.f32 %v313_v52, %v1652_v51  ;;  %v310_v58 = vadd.f32 %v309_v54, %v1657_v53  ;;  %v1670_v59 = vld [vmem:[%s1535_s18 + $0xf0] sm:$0xff]  ;;  %v321_v60 = vsel %vm260_vm0, %v1662_v55, 0.0  ;;  %v1675_v61 = vld [vmem:[%s1535_s18 + $0xe0] sm:$0xff]  ;;  %v317_v62 = vsel %vm260_vm0, %v1665_v56, 0.0  ;;  %v1680_v63 = vld [vmem:[%s1535_s18 + $0x118] sm:$0xff] }
  0x1f   : > { %v1683_v4 = vld [vmem:[%s1535_s18 + $0x108] sm:$0xff]  ;;  %v322_v8 = vadd.f32 %v321_v60, %v1670_v59  ;;  %v318_v9 = vadd.f32 %v317_v62, %v1675_v61  ;;  %v1688_v10 = vld [vmem:[%s1535_s18 + $0x110] sm:$0xff]  ;;  %v329_v13 = vsel %vm260_vm0, %v1680_v63, 0.0  ;;  %v1693_v14 = vld [vmem:[%s1535_s18 + $0x100] sm:$0xff] }
  0x20   : > { %283 = vadd.xlane.f32.xlu1 %v282_v25  ;;  %v325_v17 = vsel %vm260_vm0, %v1683_v4, 0.0  ;;  %v1698_v18 = vld [vmem:[%s1535_s18 + $0x138] sm:$0xff]  ;;  %v1701_v20 = vld [vmem:[%s1535_s18 + $0x128] sm:$0xff]  ;;  %v330_v22 = vadd.f32 %v329_v13, %v1688_v10  ;;  %v1711_v30 = vld [vmem:[%s1535_s18 + $0x120] sm:$0xff] }
  0x21   : > { %279 = vadd.xlane.f32.xlu0 %v278_v26  ;;  %v326_v25 = vadd.f32 %v325_v17, %v1693_v14  ;;  %v1706_v26 = vld [vmem:[%s1535_s18 + $0x130] sm:$0xff]  ;;  %v337_v28 = vsel %vm260_vm0, %v1698_v18, 0.0  ;;  %v1719_v36 = vld [vmem:[%s1535_s18 + $0x148] sm:$0xff]  ;;  %v1729_v46 = vld [vmem:[%s1535_s18 + $0x140] sm:$0xff] }
  0x22   : > { %v338_v38 = vadd.f32 %v337_v28, %v1706_v26  ;;  %v1737_v52 = vld [vmem:[%s1535_s18 + $0x168] sm:$0xff]  ;;  %v1747_v62 = vld [vmem:[%s1535_s18 + $0x160] sm:$0xff] }
  0x23   : > { %v1755_v13 = vld [vmem:[%s1535_s18 + $0x188] sm:$0xff] }
  0x24   : > { %291 = vadd.xlane.f32.xlu1 %v290_v33  ;;  %v333_v33 = vsel %vm260_vm0, %v1701_v20, 0.0  ;;  %2625 = vst [vmem:[#allocation2_spill] sm:$0xff] %v1755_v13 }
  0x25   : > { %287 = vadd.xlane.f32.xlu0 %v286_v34  ;;  %v1716_v34 = vld [vmem:[%s1535_s18 + $0x158] sm:$0xff] }
  0x26   : > { %v345_v44 = vsel %vm260_vm0, %v1716_v34, 0.0 }
  0x28   : > { %299 = vadd.xlane.f32.xlu1 %v298_v41  ;;  %v334_v41 = vadd.f32 %v333_v33, %v1711_v30  ;;  %v1765_v33 = vld [vmem:[%s1535_s18 + $0x180] sm:$0xff] }
  0x29   : > { %295 = vadd.xlane.f32.xlu0 %v294_v42  ;;  %v1724_v42 = vld [vmem:[%s1535_s18 + $0x150] sm:$0xff] }
  0x2a   : > { %v346_v54 = vadd.f32 %v345_v44, %v1724_v42  ;;  %v1773_v44 = vld [vmem:[%s1535_s18 + $0x1a8] sm:$0xff] }
  0x2b   : > { %2627 = vst [vmem:[#allocation4_spill] sm:$0xff] %v1773_v44  ;;  %v365_v0 = vsel %vm260_vm0, %v1773_v44, 0.0 }
  0x2c   : > { %307 = vadd.xlane.f32.xlu1 %v306_v49  ;;  %v341_v49 = vsel %vm260_vm0, %v1719_v36, 0.0 }
  0x2d   : > { %303 = vadd.xlane.f32.xlu0 %v302_v50  ;;  %v1734_v50 = vld [vmem:[%s1535_s18 + $0x178] sm:$0xff] }
  0x2e   : > { %v353_v60 = vsel %vm260_vm0, %v1734_v50, 0.0 }
  0x30   : > { %315 = vadd.xlane.f32.xlu1 %v314_v57  ;;  %v342_v57 = vadd.f32 %v341_v49, %v1729_v46 }
  0x31   : > { %311 = vadd.xlane.f32.xlu0 %v310_v58  ;;  %v1742_v58 = vld [vmem:[%s1535_s18 + $0x170] sm:$0xff] }
  0x32   : > { %v354_v17 = vadd.f32 %v353_v60, %v1742_v58 }
  0x34   : > { %323 = vadd.xlane.f32.xlu1 %v322_v8  ;;  %v349_v8 = vsel %vm260_vm0, %v1737_v52, 0.0 }
  0x35   : > { %319 = vadd.xlane.f32.xlu0 %v318_v9  ;;  %v1752_v9 = vld [vmem:[%s1535_s18 + $0x198] sm:$0xff] }
  0x36   : > { %v361_v28 = vsel %vm260_vm0, %v1752_v9, 0.0 }
  0x38   : > { %331 = vadd.xlane.f32.xlu1 %v330_v22  ;;  %v350_v22 = vadd.f32 %v349_v8, %v1747_v62  ;;  %v1783_v8 = vld [vmem:[%s1535_s18 + $0x1a0] sm:$0xff] }
  0x39   : > { %327 = vadd.xlane.f32.xlu0 %v326_v25  ;;  %v1760_v25 = vld [vmem:[%s1535_s18 + $0x190] sm:$0xff] }
  0x3a   : > { %v362_v49 = vadd.f32 %v361_v28, %v1760_v25  ;;  %v1808_v28 = vld [vmem:[%s1794_s22 + $0x18] sm:$0xff] }
  0x3b   : > { %2632 = vst [vmem:[#allocation9_spill] sm:$0xff] %v1808_v28 }
  0x3c   : > { %339 = vadd.xlane.f32.xlu1 %v338_v38  ;;  %v357_v38 = vsel %vm260_vm0, %v1755_v13, 0.0 }
  0x3d   : > { %335 = vadd.xlane.f32.xlu0 %v334_v41  ;;  %v1770_v41 = vld [vmem:[%s1535_s18 + $0x1b8] sm:$0xff] }
  0x3e   : > { %2626 = vst [vmem:[#allocation3_spill] sm:$0xff] %v1770_v41  ;;  %v369_v60 = vsel %vm260_vm0, %v1770_v41, 0.0 }
  0x40   : > { %347 = vadd.xlane.f32.xlu1 %v346_v54  ;;  %v358_v54 = vadd.f32 %v357_v38, %v1765_v33  ;;  %v1812_v38 = vld [vmem:[%s1794_s22 + $0x20] sm:$0xff] }
  0x41   : > { %343 = vadd.xlane.f32.xlu0 %v342_v57  ;;  %v1778_v57 = vld [vmem:[%s1535_s18 + $0x1b0] sm:$0xff]  ;;  %2633 = vst [vmem:[#allocation10_spill] sm:$0xff] %v1812_v38 }
  0x42   : > { %2628 = vst [vmem:[#allocation5_spill] sm:$0xff] %v1778_v57  ;;  %v370_v13 = vadd.f32 %v369_v60, %v1778_v57  ;;  %v1824_v60 = vld [vmem:[%s1794_s22 + $0x38] sm:$0xff] }
  0x43   : > { %2636 = vst [vmem:[#allocation13_spill] sm:$0xff] %v1824_v60 }
  0x44   : > { %355 = vadd.xlane.f32.xlu1 %v354_v17  ;;  %v366_v17 = vadd.f32 %v365_v0, %v1783_v8  ;;  %v1801_v0 = vld [vmem:[%s1794_s22 + $0x10] sm:$0xff] }
  0x45   : > { %351 = vadd.xlane.f32.xlu0 %v350_v22  ;;  %v1797_v22 = vld [vmem:[%s1794_s22] sm:$0xff]  ;;  %2630 = vst [vmem:[#allocation7_spill] sm:$0xff] %v1801_v0 }
  0x46   : > { %2629 = vst [vmem:[#allocation6_spill] sm:$0xff] %v1797_v22 }
  0x48   : > { %363 = vadd.xlane.f32.xlu1 %v362_v49  ;;  %v1816_v49 = vld [vmem:[%s1794_s22 + $0x28] sm:$0xff] }
  0x49   : > { %359 = vadd.xlane.f32.xlu0 %v358_v54  ;;  %2634 = vst [vmem:[#allocation11_spill] sm:$0xff] %v1816_v49  ;;  %v1820_v54 = vld [vmem:[%s1794_s22 + $0x30] sm:$0xff] }
  0x4a   : > { %2635 = vst [vmem:[#allocation12_spill] sm:$0xff] %v1820_v54 }
  0x4c   : > { %371 = vadd.xlane.f32.xlu1 %v370_v13  ;;  %v1804_v13 = vld [vmem:[%s1794_s22 + $0x8] sm:$0xff] }
  0x4d   : > { %367 = vadd.xlane.f32.xlu0 %v366_v17  ;;  %2631 = vst [vmem:[#allocation8_spill] sm:$0xff] %v1804_v13  ;;  %v1828_v17 = vld [vmem:[%s1794_s22 + $0x40] sm:$0xff] }
  0x4e   : > { %2637 = vst [vmem:[#allocation14_spill] sm:$0xff] %v1828_v17 }
  0x5d   : > { %1077 = vperm.xlu1 %1425, %v1797_v22  }
  0x61   : > { %1087 = vperm.xlu1 %1425, %v1801_v0   ;;  %v1852_v0 = vld [vmem:[%s1794_s22 + $0x70] sm:$0xff] }
  0x62   : > { %2643 = vst [vmem:[#allocation20_spill] sm:$0xff] %v1852_v0 }
  0x63   : > { %1082 = vperm.xlu0 %1426, %v1804_v13  }
  0x65   : > { %1092 = vperm.xlu1 %1425, %v1808_v28   ;;  %v1832_v28 = vld [vmem:[%s1794_s22 + $0x48] sm:$0xff] }
  0x66   : > { %2638 = vst [vmem:[#allocation15_spill] sm:$0xff] %v1832_v28 }
  0x67   : > { %1097 = vperm.xlu0 %1426, %v1812_v38   ;;  %v1836_v38 = vld [vmem:[%s1794_s22 + $0x50] sm:$0xff] }
  0x68   : > { %2639 = vst [vmem:[#allocation16_spill] sm:$0xff] %v1836_v38 }
  0x69   : > { %1102 = vperm.xlu1 %1425, %v1816_v49   ;;  %v1840_v49 = vld [vmem:[%s1794_s22 + $0x58] sm:$0xff] }
  0x6a   : > { %2640 = vst [vmem:[#allocation17_spill] sm:$0xff] %v1840_v49 }
  0x6b   : > { %1107 = vperm.xlu0 %1426, %v1820_v54   ;;  %v1844_v54 = vld [vmem:[%s1794_s22 + $0x60] sm:$0xff] }
  0x6c   : > { %2641 = vst [vmem:[#allocation18_spill] sm:$0xff] %v1844_v54 }
  0x6d   : > { %1112 = vperm.xlu1 %1425, %v1824_v60   ;;  %v1848_v60 = vld [vmem:[%s1794_s22 + $0x68] sm:$0xff] }
  0x6e   : > { %2642 = vst [vmem:[#allocation19_spill] sm:$0xff] %v1848_v60 }
  0x6f   : > { %1117 = vperm.xlu0 %1426, %v1828_v17   ;;  %v1856_v17 = vld [vmem:[%s1794_s22 + $0x78] sm:$0xff] }
  0x70   : > { %2644 = vst [vmem:[#allocation21_spill] sm:$0xff] %v1856_v17 }
  0x71   : > { %1122 = vperm.xlu1 %1425, %v1832_v28   ;;  %v1860_v28 = vld [vmem:[%s1794_s22 + $0x80] sm:$0xff] }
  0x72   : > { %2645 = vst [vmem:[#allocation22_spill] sm:$0xff] %v1860_v28 }
  0x73   : > { %1127 = vperm.xlu0 %1426, %v1836_v38   ;;  %v1864_v38 = vld [vmem:[%s1794_s22 + $0x88] sm:$0xff] }
  0x74   : > { %2646 = vst [vmem:[#allocation23_spill] sm:$0xff] %v1864_v38 }
  0x75   : > { %1132 = vperm.xlu1 %1425, %v1840_v49   ;;  %v1868_v49 = vld [vmem:[%s1794_s22 + $0x90] sm:$0xff] }
  0x76   : > { %2647 = vst [vmem:[#allocation24_spill] sm:$0xff] %v1868_v49 }
  0x77   : > { %1137 = vperm.xlu0 %1426, %v1844_v54   ;;  %v1872_v54 = vld [vmem:[%s1794_s22 + $0x98] sm:$0xff] }
  0x78   : > { %2648 = vst [vmem:[#allocation25_spill] sm:$0xff] %v1872_v54 }
  0x79   : > { %1142 = vperm.xlu1 %1425, %v1848_v60  }
  0x7b   : > { %1147 = vperm.xlu0 %1426, %v1852_v0  }
  0x7d   : > { %1152 = vperm.xlu1 %1425, %v1856_v17  }
  0x7f   : > { %1157 = vperm.xlu0 %1426, %v1860_v28  }
  0x81   : > { %1162 = vperm.xlu1 %1425, %v1864_v38  }
  0x83   : > { %1167 = vperm.xlu0 %1426, %v1868_v49  }
  0x85   : > { %1172 = vperm.xlu1 %1425, %v1872_v54  }
  0xa5   : > { %v272_v60 = vpop.xlane.xlu1 %271 }
  0xa6   : > { %v375_v0 = vmul.f32 0.0051020407, %v272_v60  ;;  %v264_v13 = vpop.xlane.xlu0 %263 }
  0xa7   : > { %v373_v22 = vmul.f32 0.0051020407, %v264_v13 }
  0xa8   : > { %v1877_v17 = vsub.f32 %v1538_v1, %v375_v0  ;;  %v1880_v57 = vsub.f32 %v1541_v2, %v375_v0 }
  0xa9   : > { %v1883_v28 = vsub.f32 %v1544_v3, %v373_v22  ;;  %v1886_v38 = vsub.f32 %v1549_v5, %v373_v22  ;;  %v276_v41 = vpop.xlane.xlu1 %275 }
  0xaa   : > { %2649 = vst [vmem:[#allocation26_spill] sm:$0xff] %v1877_v17  ;;  %2650 = vst [vmem:[#allocation27_spill] sm:$0xff] %v1880_v57  ;;  %v376_v49 = vmul.f32 0.0051020407, %v276_v41  ;;  %v268_v44 = vpop.xlane.xlu0 %267  ;;  %v462_v60 = vmul.f32 %v1880_v57, %v1880_v57  ;;  %v461_v5 = vmul.f32 %v1877_v17, %v1877_v17 }
  0xab   : > { %2651 = vst [vmem:[#allocation28_spill] sm:$0xff] %v1883_v28  ;;  %2652 = vst [vmem:[#allocation29_spill] sm:$0xff] %v1886_v38  ;;  %v374_v54 = vmul.f32 0.0051020407, %v268_v44  ;;  %v457_v1 = vmul.f32 %v1883_v28, %v1883_v28  ;;  %v458_v2 = vmul.f32 %v1886_v38, %v1886_v38 }
  0xac   : > { %v1895_v0 = vsub.f32 %v1552_v6, %v376_v49  ;;  %v1898_v3 = vsub.f32 %v1555_v7, %v376_v49  ;;  %v521_v57 = vsel %vm260_vm0, %v462_v60, 0.0 }
  0xad   : > { %v1903_v41 = vsub.f32 %v1563_v11, %v374_v54  ;;  %v1906_v44 = vsub.f32 %v1566_v12, %v374_v54  ;;  %v284_v22 = vpop.xlane.xlu1 %283  ;;  %v513_v13 = vsel %vm260_vm0, %v458_v2, 0.0  ;;  %v522_v60 = vadd.f32 %v521_v57, %v461_v5 }
  0xae   : > { %2653 = vst [vmem:[#allocation30_spill] sm:$0xff] %v1898_v3  ;;  %v378_v38 = vmul.f32 0.0051020407, %v284_v22  ;;  %v280_v6 = vpop.xlane.xlu0 %279  ;;  %v514_v28 = vadd.f32 %v513_v13, %v457_v1  ;;  %v464_v7 = vmul.f32 %v1898_v3, %v1898_v3  ;;  %v463_v1 = vmul.f32 %v1895_v0, %v1895_v0 }
  0xaf   : > { %2654 = vst [vmem:[#allocation31_spill] sm:$0xff] %v1906_v44  ;;  %v377_v49 = vmul.f32 0.0051020407, %v280_v6  ;;  %v459_v17 = vmul.f32 %v1903_v41, %v1903_v41  ;;  %v460_v11 = vmul.f32 %v1906_v44, %v1906_v44 }
  0xb0   : > { %v1917_v12 = vsub.f32 %v1580_v19, %v378_v38  ;;  %v1920_v54 = vsub.f32 %v1572_v15, %v378_v38  ;;  %515 = vadd.xlane.f32.xlu0 %v514_v28  ;;  %v525_v19 = vsel %vm260_vm0, %v464_v7, 0.0 }
  0xb1   : > { %v1925_v2 = vsub.f32 %v1585_v21, %v377_v49  ;;  %v1928_v22 = vsub.f32 %v1575_v16, %v377_v49  ;;  %v292_v13 = vpop.xlane.xlu1 %291  ;;  %v517_v6 = vsel %vm260_vm0, %v460_v11, 0.0 }
  0xb2   : > { %2655 = vst [vmem:[#allocation32_spill] sm:$0xff] %v1917_v12  ;;  %2656 = vst [vmem:[#allocation33_spill] sm:$0xff] %v1920_v54  ;;  %v380_v3 = vmul.f32 0.0051020407, %v292_v13  ;;  %v288_v44 = vpop.xlane.xlu0 %287  ;;  %v518_v15 = vadd.f32 %v517_v6, %v459_v17  ;;  %v468_v57 = vmul.f32 %v1920_v54, %v1920_v54  ;;  %v467_v16 = vmul.f32 %v1917_v12, %v1917_v12 }
  0xb3   : > { %v379_v28 = vmul.f32 0.0051020407, %v288_v44  ;;  %v465_v38 = vmul.f32 %v1925_v2, %v1925_v2  ;;  %v466_v21 = vmul.f32 %v1928_v22, %v1928_v22  ;;  %v526_v17 = vadd.f32 %v525_v19, %v463_v1 }
  0xb4   : > { %v1941_v5 = vsub.f32 %v1598_v27, %v380_v3  ;;  %v1944_v7 = vsub.f32 %v1590_v23, %v380_v3  ;;  %523 = vadd.xlane.f32.xlu0 %v522_v60  ;;  %519 = vadd.xlane.f32.xlu1 %v518_v15  ;;  %v533_v44 = vsel %vm260_vm0, %v468_v57, 0.0 }
  0xb5   : > { %v1948_v49 = vsub.f32 %v1603_v29, %v379_v28  ;;  %v1951_v11 = vsub.f32 %v1593_v24, %v379_v28  ;;  %v300_v13 = vpop.xlane.xlu1 %299  ;;  %v529_v6 = vsel %vm260_vm0, %v466_v21, 0.0  ;;  %v534_v60 = vadd.f32 %v533_v44, %v467_v16 }
  0xb6   : > { %v382_v54 = vmul.f32 0.0051020407, %v300_v13  ;;  %v296_v27 = vpop.xlane.xlu0 %295  ;;  %v530_v12 = vadd.f32 %v529_v6, %v465_v38  ;;  %v472_v23 = vmul.f32 %v1944_v7, %v1944_v7  ;;  %v471_v15 = vmul.f32 %v1941_v5, %v1941_v5 }
  0xb7   : > { %v381_v3 = vmul.f32 0.0051020407, %v296_v27  ;;  %v469_v1 = vmul.f32 %v1948_v49, %v1948_v49  ;;  %v470_v29 = vmul.f32 %v1951_v11, %v1951_v11 }
  0xb8   : > { %v1961_v24 = vsub.f32 %v1616_v35, %v382_v54  ;;  %v1964_v19 = vsub.f32 %v1608_v31, %v382_v54  ;;  %527 = vadd.xlane.f32.xlu1 %v526_v17  ;;  %531 = vadd.xlane.f32.xlu0 %v530_v12  ;;  %v541_v35 = vsel %vm260_vm0, %v472_v23, 0.0 }
  0xb9   : > { %v1969_v57 = vsub.f32 %v1621_v37, %v381_v3  ;;  %v1972_v28 = vsub.f32 %v1611_v32, %v381_v3  ;;  %v308_v38 = vpop.xlane.xlu1 %307  ;;  %v537_v21 = vsel %vm260_vm0, %v470_v29, 0.0  ;;  %v542_v27 = vadd.f32 %v541_v35, %v471_v15 }
  0xba   : > { %v384_v16 = vmul.f32 0.0051020407, %v308_v38  ;;  %v304_v44 = vpop.xlane.xlu0 %303  ;;  %v538_v31 = vadd.f32 %v537_v21, %v469_v1  ;;  %v476_v12 = vmul.f32 %v1964_v19, %v1964_v19  ;;  %v475_v32 = vmul.f32 %v1961_v24, %v1961_v24 }
  0xbb   : > { %v383_v54 = vmul.f32 0.0051020407, %v304_v44  ;;  %v473_v17 = vmul.f32 %v1969_v57, %v1969_v57  ;;  %v474_v37 = vmul.f32 %v1972_v28, %v1972_v28 }
  0xbc   : > { %v1985_v13 = vsub.f32 %v1634_v43, %v384_v16  ;;  %v1988_v6 = vsub.f32 %v1626_v39, %v384_v16  ;;  %535 = vadd.xlane.f32.xlu1 %v534_v60  ;;  %539 = vadd.xlane.f32.xlu0 %v538_v31  ;;  %v549_v23 = vsel %vm260_vm0, %v476_v12, 0.0 }
  0xbd   : > { %v1992_v3 = vsub.f32 %v1639_v45, %v383_v54  ;;  %v1995_v1 = vsub.f32 %v1629_v40, %v383_v54  ;;  %v316_v29 = vpop.xlane.xlu1 %315  ;;  %v545_v38 = vsel %vm260_vm0, %v474_v37, 0.0  ;;  %v550_v16 = vadd.f32 %v549_v23, %v475_v32 }
  0xbe   : > { %v386_v21 = vmul.f32 0.0051020407, %v316_v29  ;;  %v312_v43 = vpop.xlane.xlu0 %311  ;;  %v546_v44 = vadd.f32 %v545_v38, %v473_v17  ;;  %v480_v39 = vmul.f32 %v1988_v6, %v1988_v6  ;;  %v479_v31 = vmul.f32 %v1985_v13, %v1985_v13 }
  0xbf   : > { %v385_v60 = vmul.f32 0.0051020407, %v312_v43  ;;  %v477_v15 = vmul.f32 %v1992_v3, %v1992_v3  ;;  %v478_v45 = vmul.f32 %v1995_v1, %v1995_v1 }
  0xc0   : > { %v2005_v40 = vsub.f32 %v1652_v51, %v386_v21  ;;  %v2008_v35 = vsub.f32 %v1644_v47, %v386_v21  ;;  %543 = vadd.xlane.f32.xlu1 %v542_v27  ;;  %547 = vadd.xlane.f32.xlu0 %v546_v44  ;;  %v557_v51 = vsel %vm260_vm0, %v480_v39, 0.0 }
  0xc1   : > { %v2013_v12 = vsub.f32 %v1657_v53, %v385_v60  ;;  %v2016_v54 = vsub.f32 %v1647_v48, %v385_v60  ;;  %v324_v17 = vpop.xlane.xlu1 %323  ;;  %v553_v37 = vsel %vm260_vm0, %v478_v45, 0.0  ;;  %v558_v44 = vadd.f32 %v557_v51, %v479_v31 }
  0xc2   : > { %v388_v32 = vmul.f32 0.0051020407, %v324_v17  ;;  %v320_v23 = vpop.xlane.xlu0 %319  ;;  %v554_v47 = vadd.f32 %v553_v37, %v477_v15  ;;  %v484_v27 = vmul.f32 %v2008_v35, %v2008_v35  ;;  %v483_v48 = vmul.f32 %v2005_v40, %v2005_v40 }
  0xc3   : > { %2657 = vst [vmem:[#allocation34_spill] sm:$0xff] %v2013_v12  ;;  %2658 = vst [vmem:[#allocation35_spill] sm:$0xff] %v2016_v54  ;;  %v387_v29 = vmul.f32 0.0051020407, %v320_v23  ;;  %v481_v38 = vmul.f32 %v2013_v12, %v2013_v12  ;;  %v482_v53 = vmul.f32 %v2016_v54, %v2016_v54 }
  0xc4   : > { %v2029_v21 = vsub.f32 %v1670_v59, %v388_v32  ;;  %v2032_v43 = vsub.f32 %v1662_v55, %v388_v32  ;;  %551 = vadd.xlane.f32.xlu1 %v550_v16  ;;  %555 = vadd.xlane.f32.xlu0 %v554_v47  ;;  %v565_v39 = vsel %vm260_vm0, %v484_v27, 0.0 }
  0xc5   : > { %v2036_v60 = vsub.f32 %v1675_v61, %v387_v29  ;;  %v2039_v15 = vsub.f32 %v1665_v56, %v387_v29  ;;  %v332_v45 = vpop.xlane.xlu1 %331  ;;  %v561_v17 = vsel %vm260_vm0, %v482_v53, 0.0  ;;  %v566_v32 = vadd.f32 %v565_v39, %v483_v48 }
  0xc6   : > { %v390_v37 = vmul.f32 0.0051020407, %v332_v45  ;;  %v328_v59 = vpop.xlane.xlu0 %327  ;;  %v562_v23 = vadd.f32 %v561_v17, %v481_v38  ;;  %v488_v55 = vmul.f32 %v2032_v43, %v2032_v43  ;;  %v487_v47 = vmul.f32 %v2029_v21, %v2029_v21 }
  0xc7   : > { %2659 = vst [vmem:[#allocation36_spill] sm:$0xff] %v2036_v60  ;;  %2660 = vst [vmem:[#allocation37_spill] sm:$0xff] %v2039_v15  ;;  %v389_v16 = vmul.f32 0.0051020407, %v328_v59  ;;  %v485_v31 = vmul.f32 %v2036_v60, %v2036_v60  ;;  %v486_v61 = vmul.f32 %v2039_v15, %v2039_v15 }
  0xc8   : > { %v2049_v56 = vsub.f32 %v1688_v10, %v390_v37  ;;  %v2052_v51 = vsub.f32 %v1680_v63, %v390_v37  ;;  %559 = vadd.xlane.f32.xlu1 %v558_v44  ;;  %563 = vadd.xlane.f32.xlu0 %v562_v23  ;;  %v573_v10 = vsel %vm260_vm0, %v488_v55, 0.0 }
  0xc9   : > { %v2057_v27 = vsub.f32 %v1693_v14, %v389_v16  ;;  %v2060_v29 = vsub.f32 %v1683_v4, %v389_v16  ;;  %v340_v38 = vpop.xlane.xlu1 %339  ;;  %v569_v53 = vsel %vm260_vm0, %v486_v61, 0.0  ;;  %v574_v23 = vadd.f32 %v573_v10, %v487_v47 }
  0xca   : > { %2661 = vst [vmem:[#allocation38_spill] sm:$0xff] %v2052_v51  ;;  %v392_v48 = vmul.f32 0.0051020407, %v340_v38  ;;  %v336_v39 = vpop.xlane.xlu0 %335  ;;  %v570_v63 = vadd.f32 %v569_v53, %v485_v31  ;;  %v492_v44 = vmul.f32 %v2052_v51, %v2052_v51  ;;  %v491_v4 = vmul.f32 %v2049_v56, %v2049_v56 }
  0xcb   : > { %2662 = vst [vmem:[#allocation39_spill] sm:$0xff] %v2057_v27  ;;  %2663 = vst [vmem:[#allocation40_spill] sm:$0xff] %v2060_v29  ;;  %v391_v45 = vmul.f32 0.0051020407, %v336_v39  ;;  %v489_v17 = vmul.f32 %v2057_v27, %v2057_v27  ;;  %v490_v14 = vmul.f32 %v2060_v29, %v2060_v29 }
  0xcc   : > { %v2073_v37 = vsub.f32 %v1706_v26, %v392_v48  ;;  %v2076_v59 = vsub.f32 %v1698_v18, %v392_v48  ;;  %567 = vadd.xlane.f32.xlu1 %v566_v32  ;;  %571 = vadd.xlane.f32.xlu0 %v570_v63  ;;  %v581_v55 = vsel %vm260_vm0, %v492_v44, 0.0 }
  0xcd   : > { %v2080_v16 = vsub.f32 %v1711_v30, %v391_v45  ;;  %v2083_v31 = vsub.f32 %v1701_v20, %v391_v45  ;;  %v348_v61 = vpop.xlane.xlu1 %347  ;;  %v577_v38 = vsel %vm260_vm0, %v490_v14, 0.0  ;;  %v582_v48 = vadd.f32 %v581_v55, %v491_v4 }
  0xce   : > { %2664 = vst [vmem:[#allocation41_spill] sm:$0xff] %v2073_v37  ;;  %2665 = vst [vmem:[#allocation42_spill] sm:$0xff] %v2076_v59  ;;  %v394_v53 = vmul.f32 0.0051020407, %v348_v61  ;;  %v344_v26 = vpop.xlane.xlu0 %343  ;;  %v578_v39 = vadd.f32 %v577_v38, %v489_v17  ;;  %v496_v18 = vmul.f32 %v2076_v59, %v2076_v59  ;;  %v495_v63 = vmul.f32 %v2073_v37, %v2073_v37 }
  0xcf   : > { %2666 = vst [vmem:[#allocation43_spill] sm:$0xff] %v2080_v16  ;;  %2667 = vst [vmem:[#allocation44_spill] sm:$0xff] %v2083_v31  ;;  %v393_v32 = vmul.f32 0.0051020407, %v344_v26  ;;  %v493_v47 = vmul.f32 %v2080_v16, %v2080_v16  ;;  %v494_v30 = vmul.f32 %v2083_v31, %v2083_v31 }
  0xd0   : > { %v2093_v20 = vsub.f32 %v1724_v42, %v394_v53  ;;  %v2096_v10 = vsub.f32 %v1716_v34, %v394_v53  ;;  %575 = vadd.xlane.f32.xlu1 %v574_v23  ;;  %579 = vadd.xlane.f32.xlu0 %v578_v39  ;;  %v589_v42 = vsel %vm260_vm0, %v496_v18, 0.0 }
  0xd1   : > { %v2101_v44 = vsub.f32 %v1729_v46, %v393_v32  ;;  %v2104_v45 = vsub.f32 %v1719_v36, %v393_v32  ;;  %v356_v17 = vpop.xlane.xlu1 %355  ;;  %v585_v14 = vsel %vm260_vm0, %v494_v30, 0.0  ;;  %v590_v39 = vadd.f32 %v589_v42, %v495_v63 }
  0xd2   : > { %2668 = vst [vmem:[#allocation45_spill] sm:$0xff] %v2093_v20  ;;  %2669 = vst [vmem:[#allocation46_spill] sm:$0xff] %v2096_v10  ;;  %v396_v4 = vmul.f32 0.0051020407, %v356_v17  ;;  %v352_v55 = vpop.xlane.xlu0 %351  ;;  %v586_v34 = vadd.f32 %v585_v14, %v493_v47  ;;  %v500_v23 = vmul.f32 %v2096_v10, %v2096_v10  ;;  %v499_v36 = vmul.f32 %v2093_v20, %v2093_v20 }
  0xd3   : > { %2670 = vst [vmem:[#allocation47_spill] sm:$0xff] %v2101_v44  ;;  %2671 = vst [vmem:[#allocation48_spill] sm:$0xff] %v2104_v45  ;;  %v395_v61 = vmul.f32 0.0051020407, %v352_v55  ;;  %v497_v38 = vmul.f32 %v2101_v44, %v2101_v44  ;;  %v498_v46 = vmul.f32 %v2104_v45, %v2104_v45  ;;  %v2233_v44 = vld [vmem:[%s1794_s22 + $0xc8] sm:$0xff] }
  0xd4   : > { %v2117_v53 = vsub.f32 %v1742_v58, %v396_v4  ;;  %v2120_v26 = vsub.f32 %v1734_v50, %v396_v4  ;;  %583 = vadd.xlane.f32.xlu1 %v582_v48  ;;  %587 = vadd.xlane.f32.xlu0 %v586_v34  ;;  %v597_v18 = vsel %vm260_vm0, %v500_v23, 0.0 }
  0xd5   : > { %v2124_v32 = vsub.f32 %v1747_v62, %v395_v61  ;;  %v2127_v47 = vsub.f32 %v1737_v52, %v395_v61  ;;  %v364_v30 = vpop.xlane.xlu1 %363  ;;  %v593_v17 = vsel %vm260_vm0, %v498_v46, 0.0  ;;  %v598_v4 = vadd.f32 %v597_v18, %v499_v36  ;;  %v2679_v61 = vld [vmem:[#allocation2_spill] sm:$0xff] }
  0xd6   : > { %2672 = vst [vmem:[#allocation49_spill] sm:$0xff] %v2117_v53  ;;  %2673 = vst [vmem:[#allocation50_spill] sm:$0xff] %v2120_v26  ;;  %v398_v14 = vmul.f32 0.0051020407, %v364_v30  ;;  %v360_v58 = vpop.xlane.xlu0 %359  ;;  %v594_v55 = vadd.f32 %v593_v17, %v497_v38  ;;  %v504_v50 = vmul.f32 %v2120_v26, %v2120_v26  ;;  %v503_v34 = vmul.f32 %v2117_v53, %v2117_v53 }
  0xd7   : > { %2674 = vst [vmem:[#allocation51_spill] sm:$0xff] %v2124_v32  ;;  %2675 = vst [vmem:[#allocation52_spill] sm:$0xff] %v2127_v47  ;;  %v397_v48 = vmul.f32 0.0051020407, %v360_v58  ;;  %v501_v63 = vmul.f32 %v2124_v32, %v2124_v32  ;;  %v502_v62 = vmul.f32 %v2127_v47, %v2127_v47 }
  0xd8   : > { %v2137_v52 = vsub.f32 %v1760_v25, %v398_v14  ;;  %v2140_v42 = vsub.f32 %v1752_v9, %v398_v14  ;;  %591 = vadd.xlane.f32.xlu1 %v590_v39  ;;  %595 = vadd.xlane.f32.xlu0 %v594_v55  ;;  %v605_v36 = vsel %vm260_vm0, %v504_v50, 0.0  ;;  %v2682_v55 = vld [vmem:[#allocation4_spill] sm:$0xff] }
  0xd9   : > { %v2145_v23 = vsub.f32 %v1765_v33, %v397_v48  ;;  %v2148_v38 = vsub.f32 %v2679_v61, %v397_v48  ;;  %v601_v46 = vsel %vm260_vm0, %v502_v62, 0.0  ;;  %v606_v17 = vadd.f32 %v605_v36, %v503_v34  ;;  %v2174_v36 = vld [vmem:[%s1794_s22 + $0xa8] sm:$0xff] }
  0xda   : > { %2676 = vst [vmem:[#allocation53_spill] sm:$0xff] %v2137_v52  ;;  %2677 = vst [vmem:[#allocation54_spill] sm:$0xff] %v2140_v42  ;;  %v368_v25 = vpop.xlane.xlu0 %367  ;;  %v602_v18 = vadd.f32 %v601_v46, %v501_v63  ;;  %v508_v9 = vmul.f32 %v2140_v42, %v2140_v42  ;;  %v507_v14 = vmul.f32 %v2137_v52, %v2137_v52 }
  0xdb   : > { %2678 = vst [vmem:[#allocation55_spill] sm:$0xff] %v2145_v23  ;;  %2680 = vst [vmem:[#allocation2_spill] sm:$0xff] %v2148_v38  ;;  %v399_v39 = vmul.f32 0.0051020407, %v368_v25  ;;  %v505_v30 = vmul.f32 %v2145_v23, %v2145_v23  ;;  %v506_v33 = vmul.f32 %v2148_v38, %v2148_v38  ;;  %v2178_v25 = vld [vmem:[%s1794_s22 + $0xb8] sm:$0xff] }
  0xdc   : > { %599 = vadd.xlane.f32.xlu1 %v598_v4  ;;  %603 = vadd.xlane.f32.xlu0 %v602_v18  ;;  %v613_v63 = vsel %vm260_vm0, %v508_v9, 0.0  ;;  %v2181_v18 = vld [vmem:[%s1794_s22 + $0xa0] sm:$0xff]  ;;  %v372_v9 = vpop.xlane.xlu1 %371 }
  0xdd   : > { %v2161_v58 = vsub.f32 %v1783_v8, %v399_v39  ;;  %v2164_v50 = vsub.f32 %v2682_v55, %v399_v39  ;;  %v609_v48 = vsel %vm260_vm0, %v506_v33, 0.0  ;;  %v614_v8 = vadd.f32 %v613_v63, %v507_v14  ;;  %v2186_v39 = vld [vmem:[%s1794_s22 + $0xb0] sm:$0xff] }
  0xde   : > { %v610_v62 = vadd.f32 %v609_v48, %v505_v30  ;;  %v2190_v30 = vld [vmem:[%s1794_s22 + $0xc0] sm:$0xff]  ;;  %v400_v48 = vmul.f32 0.0051020407, %v372_v9 }
  0xdf   : > { %2681 = vst [vmem:[#allocation56_spill] sm:$0xff] %v2161_v58  ;;  %2683 = vst [vmem:[#allocation4_spill] sm:$0xff] %v2164_v50  ;;  %v509_v4 = vmul.f32 %v2161_v58, %v2161_v58  ;;  %v510_v34 = vmul.f32 %v2164_v50, %v2164_v50 }
  0xe0   : > { %607 = vadd.xlane.f32.xlu1 %v606_v17  ;;  %611 = vadd.xlane.f32.xlu0 %v610_v62  ;;  %v2192_v33 = vpop.permute.xlu1 %1077  ;;  %v1496_v17 = vmov 0  }
  0xe1   : > { %v617_v61 = vsel %vm260_vm0, %v510_v34, 0.0 }
  0xe2   : > { %v618_v46 = vadd.f32 %v617_v61, %v509_v4  ;;  %v2197_v55 = vpop.permute.xlu0 %1082  ;;  %v2684_v4 = vld [vmem:[#allocation3_spill] sm:$0xff] }
  0xe3   : > { %v2204_v34 = vsub.f32 %v2684_v4, %v400_v48 }
  0xe4   : > { %615 = vadd.xlane.f32.xlu1 %v614_v8  ;;  %619 = vadd.xlane.f32.xlu0 %v618_v46  ;;  %v2195_v14 = vpop.permute.xlu1 %1087  ;;  %v2686_v8 = vld [vmem:[#allocation5_spill] sm:$0xff] }
  0xe5   : > { %2685 = vst [vmem:[#allocation3_spill] sm:$0xff] %v2204_v34  ;;  %v2207_v61 = vsub.f32 %v2686_v8, %v400_v48  ;;  %v512_v50 = vmul.f32 %v2204_v34, %v2204_v34 }
  0xe6   : > { %v2201_v62 = vpop.permute.xlu0 %1097 }
  0xe7   : > { %2687 = vst [vmem:[#allocation5_spill] sm:$0xff] %v2207_v61  ;;  %v511_v9 = vmul.f32 %v2207_v61, %v2207_v61  ;;  %v621_v38 = vsel %vm260_vm0, %v512_v50, 0.0 }
  0xe8   : > { %v2199_v63 = vpop.permute.xlu1 %1092 }
  0xe9   : > { %v622_v47 = vadd.f32 %v621_v38, %v511_v9 }
  0xea   : > { %v2213_v58 = vpop.permute.xlu0 %1107 }
  0xec   : > { %v2209_v46 = vpop.permute.xlu1 %1102 }
  0xee   : > { %v2220_v4 = vpop.permute.xlu0 %1117 }
  0xf0   : > { %v2218_v23 = vpop.permute.xlu1 %1112 }
  0xf2   : > { %v2224_v8 = vpop.permute.xlu0 %1127 }
  0xf3   : > { %2688 = vst [vmem:[#allocation57_spill] sm:$0xff] %v2224_v8 }
  0xf4   : > { %v2222_v48 = vpop.permute.xlu1 %1122 }
  0xf5   : > { %1182 = vperm.xlu1 %1425, %v2174_v36  }
  0xf6   : > { %v2228_v34 = vpop.permute.xlu0 %1137 }
  0xf7   : > { %2689 = vst [vmem:[#allocation58_spill] sm:$0xff] %v2228_v34 }
  0xf8   : > { %v2226_v32 = vpop.permute.xlu1 %1132 }
  0xf9   : > { %1192 = vperm.xlu1 %1425, %v2178_v25  }
  0xfa   : > { %1177 = vperm.xlu0 %1426, %v2181_v18   ;;  %v2235_v61 = vpop.permute.xlu0 %1147 }
  0xfb   : > { %2690 = vst [vmem:[#allocation59_spill] sm:$0xff] %v2235_v61 }
  0xfc   : > { %v2230_v45 = vpop.permute.xlu1 %1142 }
  0xfe   : > { %1187 = vperm.xlu0 %1426, %v2186_v39  }
 0x100   : > { %v2238_v50 = vpop.permute.xlu1 %1152 }
 0x102   : > { %1197 = vperm.xlu0 %1426, %v2190_v30  }
 0x104   : > { %v2242_v38 = vpop.permute.xlu1 %1162 }
 0x105   : > { %2692 = vst [vmem:[#allocation61_spill] sm:$0xff] %v2242_v38 }
 0x106   : > { %1427 = vset.pattern.permute.xlu0 %v1496_v17 }
 0x108   : > { %v2246_v42 = vpop.permute.xlu1 %1172 }
 0x109   : > { %2694 = vst [vmem:[#allocation63_spill] sm:$0xff] %v2246_v42 }
 0x11d   : > { %623 = vadd.xlane.f32.xlu1 %v622_v47  ;;  %v2240_v47 = vpop.permute.xlu0 %1157 }
 0x11e   : > { %2691 = vst [vmem:[#allocation60_spill] sm:$0xff] %v2240_v47 }
 0x121   : > { %v2244_v9 = vpop.permute.xlu0 %1167 }
 0x122   : > { %2693 = vst [vmem:[#allocation62_spill] sm:$0xff] %v2244_v9 }
 0x12e   : > { %1202 = vperm.xlu1 %1425, %v2233_v44  }
 0x132   : > { %1428 = vset.pattern.permute.xlu1 %v1496_v17 }
 0x13d   : > { %v516_v52 = vpop.xlane.xlu0 %515 }
 0x13e   : > { %v625_v31 = vmul.f32 0.0051020407, %v516_v52 }
 0x140   : > { %v653_v16 = vadd.f32 1e-05, %v625_v31 }
 0x141   : > { %v520_v26 = vpop.xlane.xlu1 %519  ;;  %v524_v53 = vpop.xlane.xlu0 %523 }
 0x142   : > { %1431 = vrsqrt.f32 %v653_v16  ;;  %v626_v29 = vmul.f32 0.0051020407, %v520_v26  ;;  %v627_v27 = vmul.f32 0.0051020407, %v524_v53  ;;  %v2695_v16 = vld [vmem:[#allocation6_spill] sm:$0xff] }
 0x144   : > { %v654_v61 = vadd.f32 1e-05, %v626_v29  ;;  %v655_v10 = vadd.f32 1e-05, %v627_v27 }
 0x145   : > { %v528_v20 = vpop.xlane.xlu1 %527  ;;  %v532_v17 = vpop.xlane.xlu0 %531 }
 0x146   : > { %1433 = vrsqrt.f32 %v654_v61  ;;  %v628_v47 = vmul.f32 0.0051020407, %v528_v20  ;;  %v629_v15 = vmul.f32 0.0051020407, %v532_v17  ;;  %v2696_v17 = vld [vmem:[#allocation8_spill] sm:$0xff] }
 0x147   : > { %1435 = vrsqrt.f32 %v655_v10 }
 0x148   : > { %v656_v60 = vadd.f32 1e-05, %v628_v47  ;;  %v657_v42 = vadd.f32 1e-05, %v629_v15 }
 0x149   : > { %v536_v9 = vpop.xlane.xlu1 %535  ;;  %v540_v34 = vpop.xlane.xlu0 %539 }
 0x14a   : > { %1437 = vrsqrt.f32 %v656_v60  ;;  %v630_v31 = vmul.f32 0.0051020407, %v536_v9  ;;  %v631_v37 = vmul.f32 0.0051020407, %v540_v34 }
 0x14b   : > { %1439 = vrsqrt.f32 %v657_v42 }
 0x14c   : > { %v1432_v59 = vpop.eup %1431  ;;  %v658_v29 = vadd.f32 1e-05, %v630_v31  ;;  %v659_v61 = vadd.f32 1e-05, %v631_v37 }
 0x14d   : > { %v544_v52 = vpop.xlane.xlu1 %543  ;;  %v795_v26 = vmul.f32 %v1432_v59, %v2695_v16  ;;  %v548_v53 = vpop.xlane.xlu0 %547  ;;  %v2697_v59 = vld [vmem:[#allocation7_spill] sm:$0xff] }
 0x14e   : > { %v632_v15 = vmul.f32 0.0051020407, %v544_v52  ;;  %1441 = vrsqrt.f32 %v658_v29  ;;  %v633_v34 = vmul.f32 0.0051020407, %v548_v53  ;;  %v2698_v52 = vld [vmem:[#allocation9_spill] sm:$0xff]  ;;  %v2699_v53 = vld [vmem:[#allocation10_spill] sm:$0xff] }
 0x14f   : > { %825 = vperm.xlu0 %1427, %v795_v26   ;;  %1443 = vrsqrt.f32 %v659_v61 }
 0x150   : > { %v1434_v27 = vpop.eup %1433  ;;  %v660_v37 = vadd.f32 1e-05, %v632_v15  ;;  %v661_v8 = vadd.f32 1e-05, %v633_v34 }
 0x151   : > { %v552_v20 = vpop.xlane.xlu1 %551  ;;  %v796_v10 = vmul.f32 %v1434_v27, %v2696_v17  ;;  %v556_v47 = vpop.xlane.xlu0 %555 }
 0x152   : > { %v1436_v38 = vpop.eup %1435  ;;  %v634_v54 = vmul.f32 0.0051020407, %v552_v20  ;;  %v635_v17 = vmul.f32 0.0051020407, %v556_v47 }
 0x153   : > { %830 = vperm.xlu1 %1428, %v796_v10   ;;  %v797_v16 = vmul.f32 %v1436_v38, %v2697_v59 }
 0x154   : > { %v662_v60 = vadd.f32 1e-05, %v634_v54  ;;  %v1438_v26 = vpop.eup %1437  ;;  %v663_v61 = vadd.f32 1e-05, %v635_v17 }
 0x155   : > { %v560_v9 = vpop.xlane.xlu1 %559  ;;  %v564_v42 = vpop.xlane.xlu0 %563  ;;  %v798_v10 = vmul.f32 %v1438_v26, %v2698_v52  ;;  %v2700_v52 = vld [vmem:[#allocation15_spill] sm:$0xff] }
 0x156   : > { %1445 = vrsqrt.f32 %v662_v60  ;;  %v636_v31 = vmul.f32 0.0051020407, %v560_v9  ;;  %v1440_v12 = vpop.eup %1439  ;;  %v637_v60 = vmul.f32 0.0051020407, %v564_v42  ;;  %v2702_v42 = vld [vmem:[#allocation12_spill] sm:$0xff] }
 0x157   : > { %835 = vperm.xlu1 %1428, %v797_v16   ;;  %v799_v38 = vmul.f32 %v1440_v12, %v2699_v53  ;;  %v2701_v12 = vld [vmem:[#allocation11_spill] sm:$0xff] }
 0x158   : > { %v664_v27 = vadd.f32 1e-05, %v636_v31  ;;  %v1442_v16 = vpop.eup %1441 }
 0x159   : > { %v568_v20 = vpop.xlane.xlu1 %567  ;;  %v572_v29 = vpop.xlane.xlu0 %571  ;;  %v800_v17 = vmul.f32 %v1442_v16, %v2701_v12 }
 0x15a   : > { %1447 = vrsqrt.f32 %v664_v27  ;;  %v638_v54 = vmul.f32 0.0051020407, %v568_v20  ;;  %v1444_v34 = vpop.eup %1443  ;;  %v665_v27 = vadd.f32 1e-05, %v637_v60  ;;  %v639_v20 = vmul.f32 0.0051020407, %v572_v29 }
 0x15b   : > { %1449 = vrsqrt.f32 %v660_v37  ;;  %840 = vperm.xlu1 %1428, %v798_v10   ;;  %v801_v53 = vmul.f32 %v1444_v34, %v2702_v42  ;;  %v2703_v29 = vld [vmem:[#allocation17_spill] sm:$0xff] }
 0x15c   : > { %v666_v59 = vadd.f32 1e-05, %v638_v54  ;;  %1451 = vrsqrt.f32 %v661_v8 }
 0x15d   : > { %v576_v15 = vpop.xlane.xlu1 %575  ;;  %v580_v9 = vpop.xlane.xlu0 %579 }
 0x15e   : > { %1453 = vrsqrt.f32 %v666_v59  ;;  %v640_v47 = vmul.f32 0.0051020407, %v576_v15 }
 0x15f   : > { %845 = vperm.xlu1 %1428, %v799_v38   ;;  %1455 = vrsqrt.f32 %v663_v61  ;;  %v667_v61 = vadd.f32 1e-05, %v639_v20 }
 0x160   : > { %v1446_v31 = vpop.eup %1445  ;;  %v668_v26 = vadd.f32 1e-05, %v640_v47  ;;  %v641_v47 = vmul.f32 0.0051020407, %v580_v9 }
 0x161   : > { %v584_v37 = vpop.xlane.xlu1 %583  ;;  %v804_v10 = vmul.f32 %v1446_v31, %v2700_v52  ;;  %v588_v54 = vpop.xlane.xlu0 %587 }
 0x162   : > { %1457 = vrsqrt.f32 %v668_v26  ;;  %v642_v8 = vmul.f32 0.0051020407, %v584_v37  ;;  %v669_v34 = vadd.f32 1e-05, %v641_v47 }
 0x163   : > { %870 = vperm.xlu0 %1427, %v804_v10   ;;  %850 = vperm.xlu1 %1428, %v800_v17   ;;  %1459 = vrsqrt.f32 %v665_v27  ;;  %v2704_v10 = vld [vmem:[#allocation13_spill] sm:$0xff]  ;;  %v643_v17 = vmul.f32 0.0051020407, %v588_v54  ;;  %v2705_v27 = vld [vmem:[#allocation19_spill] sm:$0xff] }
 0x164   : > { %v1448_v59 = vpop.eup %1447  ;;  %v670_v15 = vadd.f32 1e-05, %v642_v8 }
 0x165   : > { %v1450_v38 = vpop.eup %1449  ;;  %v592_v60 = vpop.xlane.xlu1 %591  ;;  %v806_v51 = vmul.f32 %v1448_v59, %v2703_v29  ;;  %v2706_v59 = vld [vmem:[#allocation14_spill] sm:$0xff] }
 0x166   : > { %1461 = vrsqrt.f32 %v670_v15  ;;  %v644_v31 = vmul.f32 0.0051020407, %v592_v60  ;;  %v1452_v52 = vpop.eup %1451  ;;  %v596_v16 = vpop.xlane.xlu0 %595  ;;  %v802_v12 = vmul.f32 %v1450_v38, %v2704_v10  ;;  %v671_v60 = vadd.f32 1e-05, %v643_v17 }
 0x167   : > { %880 = vperm.xlu0 %1427, %v806_v51   ;;  %855 = vperm.xlu1 %1428, %v801_v53   ;;  %1463 = vrsqrt.f32 %v667_v61  ;;  %v803_v15 = vmul.f32 %v1452_v52, %v2706_v59  ;;  %v645_v29 = vmul.f32 0.0051020407, %v596_v16  ;;  %v2707_v61 = vld [vmem:[#allocation21_spill] sm:$0xff] }
 0x168   : > { %v1454_v26 = vpop.eup %1453  ;;  %v672_v37 = vadd.f32 1e-05, %v644_v31 }
 0x169   : > { %v600_v8 = vpop.xlane.xlu1 %599  ;;  %v808_v20 = vmul.f32 %v1454_v26, %v2705_v27  ;;  %v1456_v9 = vpop.eup %1455  ;;  %v2708_v26 = vld [vmem:[#allocation16_spill] sm:$0xff]  ;;  %v673_v52 = vadd.f32 1e-05, %v645_v29 }
 0x16a   : > { %1465 = vrsqrt.f32 %v672_v37  ;;  %v646_v42 = vmul.f32 0.0051020407, %v600_v8  ;;  %v604_v38 = vpop.xlane.xlu0 %603  ;;  %v805_v37 = vmul.f32 %v1456_v9, %v2708_v26  ;;  %v2711_v9 = vld [vmem:[#allocation25_spill] sm:$0xff] }
 0x16b   : > { %890 = vperm.xlu0 %1427, %v808_v20   ;;  %860 = vperm.xlu1 %1428, %v802_v12   ;;  %1467 = vrsqrt.f32 %v669_v34  ;;  %v2709_v20 = vld [vmem:[#allocation23_spill] sm:$0xff]  ;;  %v647_v16 = vmul.f32 0.0051020407, %v604_v38 }
 0x16c   : > { %v1458_v51 = vpop.eup %1457  ;;  %v674_v53 = vadd.f32 1e-05, %v646_v42 }
 0x16d   : > { %v608_v31 = vpop.xlane.xlu1 %607  ;;  %v810_v47 = vmul.f32 %v1458_v51, %v2707_v61  ;;  %v1460_v10 = vpop.eup %1459  ;;  %v2710_v51 = vld [vmem:[#allocation18_spill] sm:$0xff] }
 0x16e   : > { %1469 = vrsqrt.f32 %v674_v53  ;;  %v648_v54 = vmul.f32 0.0051020407, %v608_v31  ;;  %v612_v59 = vpop.xlane.xlu0 %611  ;;  %v807_v53 = vmul.f32 %v1460_v10, %v2710_v51 }
 0x16f   : > { %900 = vperm.xlu0 %1427, %v810_v47   ;;  %865 = vperm.xlu1 %1428, %v803_v15   ;;  %1471 = vrsqrt.f32 %v671_v60  ;;  %v675_v47 = vadd.f32 1e-05, %v647_v16  ;;  %v649_v60 = vmul.f32 0.0051020407, %v612_v59 }
 0x170   : > { %v1462_v8 = vpop.eup %1461  ;;  %v676_v12 = vadd.f32 1e-05, %v648_v54  ;;  %v2712_v54 = vld [vmem:[#allocation20_spill] sm:$0xff] }
 0x171   : > { %v616_v27 = vpop.xlane.xlu1 %615  ;;  %v812_v34 = vmul.f32 %v1462_v8, %v2709_v20  ;;  %v1464_v42 = vpop.eup %1463 }
 0x172   : > { %1473 = vrsqrt.f32 %v676_v12  ;;  %v650_v17 = vmul.f32 0.0051020407, %v616_v27  ;;  %v809_v38 = vmul.f32 %v1464_v42, %v2712_v54  ;;  %v620_v8 = vpop.xlane.xlu0 %619  ;;  %v2714_v42 = vld [vmem:[#allocation24_spill] sm:$0xff]  ;;  %v2715_v54 = vmov 1  }
 0x173   : > { %910 = vperm.xlu0 %1427, %v812_v34   ;;  %875 = vperm.xlu1 %1428, %v805_v37   ;;  %1475 = vrsqrt.f32 %v673_v52  ;;  %v677_v37 = vadd.f32 1e-05, %v649_v60  ;;  %v651_v10 = vmul.f32 0.0051020407, %v620_v8  ;;  %v2713_v52 = vld [vmem:[#allocation22_spill] sm:$0xff]  ;;  %v737_v60 = vld [vmem:[%s1794_s22 + $0xd0] sm:$0xff] }
 0x174   : > { %v1466_v31 = vpop.eup %1465  ;;  %v678_v15 = vadd.f32 1e-05, %v650_v17 }
 0x175   : > { %v814_v61 = vmul.f32 %v1466_v31, %v2711_v9  ;;  %v1468_v29 = vpop.eup %1467  ;;  %v679_v17 = vadd.f32 1e-05, %v651_v10 }
 0x176   : > { %1477 = vrsqrt.f32 %v678_v15  ;;  %v811_v20 = vmul.f32 %v1468_v29, %v2713_v52 }
 0x177   : > { %920 = vperm.xlu0 %1427, %v814_v61   ;;  %885 = vperm.xlu1 %1428, %v807_v53   ;;  %1479 = vrsqrt.f32 %v675_v47 }
 0x178   : > { %v1470_v26 = vpop.eup %1469  ;;  %1481 = vrsqrt.f32 %v677_v37 }
 0x179   : > { %v816_v12 = vmul.f32 %v1470_v26, %v2174_v36  ;;  %v1472_v27 = vpop.eup %1471  ;;  %1483 = vrsqrt.f32 %v679_v17  ;;  %v2281_v37 = vpop.permute.xlu0 %1177  ;;  %v2716_v17 = vld [vmem:[#allocation28_spill] sm:$0xff] }
 0x17a   : > { %v813_v51 = vmul.f32 %v1472_v27, %v2714_v42  ;;  %v2717_v42 = vld [vmem:[#allocation29_spill] sm:$0xff] }
 0x17b   : > { %930 = vperm.xlu0 %1427, %v816_v12   ;;  %895 = vperm.xlu1 %1428, %v809_v38   ;;  %v2277_v38 = vpop.permute.xlu1 %1182 }
 0x17c   : > { %v1474_v34 = vpop.eup %1473 }
 0x17d   : > { %v818_v16 = vmul.f32 %v1474_v34, %v2178_v25  ;;  %v1476_v59 = vpop.eup %1475  ;;  %v2284_v10 = vpop.permute.xlu0 %1187  ;;  %v740_v34 = vld [vmem:[%s2292_s25 + $0x8] sm:$0xff] }
 0x17e   : > { %v815_v31 = vmul.f32 %v1476_v59, %v2181_v18 }
 0x17f   : > { %940 = vperm.xlu0 %1427, %v818_v16   ;;  %905 = vperm.xlu1 %1428, %v811_v20   ;;  %v2279_v18 = vpop.permute.xlu1 %1192  ;;  %v739_v20 = vld [vmem:[%s2292_s25] sm:$0xff] }
 0x180   : > { %v1478_v36 = vpop.eup %1477 }
 0x181   : > { %v820_v53 = vmul.f32 %v1478_v36, %v2233_v44  ;;  %v1480_v15 = vpop.eup %1479  ;;  %v738_v44 = vld [vmem:[%s1794_s22 + $0xd8] sm:$0xff]  ;;  %v2286_v27 = vpop.permute.xlu0 %1197 }
 0x182   : > { %v817_v25 = vmul.f32 %v1480_v15, %v2186_v39  ;;  %v1482_v9 = vpop.eup %1481  ;;  %v742_v15 = vld [vmem:[%s2292_s25 + $0x18] sm:$0xff] }
 0x183   : > { %950 = vperm.xlu0 %1427, %v820_v53   ;;  %915 = vperm.xlu1 %1428, %v813_v51   ;;  %v819_v61 = vmul.f32 %v1482_v9, %v2190_v30  ;;  %v1484_v47 = vpop.eup %1483 }
 0x184   : > { %v821_v29 = vmul.f32 %v1484_v47, %v737_v60 }
 0x187   : > { %925 = vperm.xlu1 %1428, %v815_v31   ;;  %v741_v31 = vld [vmem:[%s2292_s25 + $0x10] sm:$0xff] }
 0x18b   : > { %935 = vperm.xlu1 %1428, %v817_v25  }
 0x18f   : > { %945 = vperm.xlu1 %1428, %v819_v61  }
 0x193   : > { %955 = vperm.xlu1 %1428, %v821_v29  }
 0x197   : > { %1430 = vset.pattern.permute.xlu1 %v2715_v54 }
 0x198   : > { %1212 = vperm.xlu1 %1430, %v738_v44  }
 0x1aa   : > { %v624_v26 = vpop.xlane.xlu1 %623 }
 0x1ab   : > { %v652_v39 = vmul.f32 0.0051020407, %v624_v26  ;;  %v743_v26 = vld [vmem:[%s2292_s25 + $0x20] sm:$0xff] }
 0x1ad   : > { %v680_v8 = vadd.f32 1e-05, %v652_v39  ;;  %v744_v39 = vld [vmem:[%s2292_s25 + $0x28] sm:$0xff] }
 0x1ae   : > { %v2294_v52 = vpop.permute.xlu1 %1202 }
 0x1af   : > { %1485 = vrsqrt.f32 %v680_v8 }
 0x1b9   : > { %v1486_v12 = vpop.eup %1485 }
 0x1ba   : > { %v822_v30 = vmul.f32 %v1486_v12, %v738_v44 }
 0x1bc   : > { %960 = vperm.xlu0 %1427, %v822_v30   ;;  %v2719_v30 = vld [vmem:[#allocation26_spill] sm:$0xff] }
 0x1c0   : > { %1429 = vset.pattern.permute.xlu0 %v2715_v54 }
 0x1c1   : > { %1207 = vperm.xlu0 %1429, %v737_v60   ;;  %v2718_v60 = vld [vmem:[#allocation31_spill] sm:$0xff] }
 0x1ce   : > { %v826_v16 = vpop.permute.xlu0 %825 }
 0x1cf   : > { %v963_v59 = vmul.f32 %v826_v16, %v2716_v17  ;;  %v964_v51 = vmul.f32 %v826_v16, %v2717_v42  ;;  %v746_v42 = vld [vmem:[%s2292_s25 + $0x38] sm:$0xff] }
 0x1d1   : > { %v1019_v36 = vadd.f32 %v963_v59, %v739_v20  ;;  %v1020_v53 = vadd.f32 %v964_v51, %v740_v34  ;;  %v2720_v20 = vld [vmem:[#allocation27_spill] sm:$0xff]  ;;  %v745_v59 = vld [vmem:[%s2292_s25 + $0x30] sm:$0xff] }
 0x1d2   : > { %v831_v25 = vpop.permute.xlu1 %830 }
 0x1d3   : > { %v1215_v9 = vadd.f32 %v2192_v33, %v1019_v36  ;;  %v1216_v61 = vadd.f32 %v2192_v33, %v1020_v53  ;;  %v965_v47 = vmul.f32 %v831_v25, %v1903_v41  ;;  %v966_v29 = vmul.f32 %v831_v25, %v2718_v60 }
 0x1d5   : > { %1271 = vst [vmem:[%s2304_s28] sm:$0xff] %v1215_v9  ;;  %1272 = vst.msk [vmem:[%s2304_s28 + $0x8] sm:$0xff] %vm260_vm0, %v1216_v61  ;;  %v1021_v44 = vadd.f32 %v965_v47, %v741_v31  ;;  %v1022_v54 = vadd.f32 %v966_v29, %v742_v15  ;;  %v2721_v31 = vld [vmem:[#allocation30_spill] sm:$0xff]  ;;  %v748_v47 = vld [vmem:[%s2292_s25 + $0x48] sm:$0xff] }
 0x1d6   : > { %v836_v8 = vpop.permute.xlu1 %835  ;;  %v747_v61 = vld [vmem:[%s2292_s25 + $0x40] sm:$0xff] }
 0x1d7   : > { %v1217_v12 = vadd.f32 %v2197_v55, %v1021_v44  ;;  %v1218_v33 = vadd.f32 %v2197_v55, %v1022_v54  ;;  %v967_v41 = vmul.f32 %v836_v8, %v2719_v30  ;;  %v968_v34 = vmul.f32 %v836_v8, %v2720_v20  ;;  %v750_v8 = vld [vmem:[%s2292_s25 + $0x58] sm:$0xff] }
 0x1d9   : > { %1273 = vst [vmem:[%s2304_s28 + $0x10] sm:$0xff] %v1217_v12  ;;  %1274 = vst.msk [vmem:[%s2304_s28 + $0x18] sm:$0xff] %vm260_vm0, %v1218_v33  ;;  %v1023_v16 = vadd.f32 %v967_v41, %v743_v26  ;;  %v1024_v17 = vadd.f32 %v968_v34, %v744_v39  ;;  %v749_v39 = vld [vmem:[%s2292_s25 + $0x50] sm:$0xff] }
 0x1da   : > { %v841_v51 = vpop.permute.xlu1 %840  ;;  %v757_v34 = vld [vmem:[%s2292_s25 + $0x90] sm:$0xff] }
 0x1db   : > { %v1219_v36 = vadd.f32 %v2195_v14, %v1023_v16  ;;  %v1220_v55 = vadd.f32 %v2195_v14, %v1024_v17  ;;  %v969_v53 = vmul.f32 %v841_v51, %v1895_v0  ;;  %v970_v15 = vmul.f32 %v841_v51, %v2721_v31  ;;  %v758_v16 = vld [vmem:[%s2292_s25 + $0x98] sm:$0xff] }
 0x1dd   : > { %1275 = vst [vmem:[%s2304_s28 + $0x20] sm:$0xff] %v1219_v36  ;;  %1276 = vst.msk [vmem:[%s2304_s28 + $0x28] sm:$0xff] %vm260_vm0, %v1220_v55  ;;  %v1025_v25 = vadd.f32 %v969_v53, %v745_v59  ;;  %v1026_v9 = vadd.f32 %v970_v15, %v746_v42  ;;  %v751_v55 = vld [vmem:[%s2292_s25 + $0x60] sm:$0xff]  ;;  %v752_v53 = vld [vmem:[%s2292_s25 + $0x68] sm:$0xff] }
 0x1de   : > { %v846_v60 = vpop.permute.xlu1 %845 }
 0x1df   : > { %v1221_v29 = vadd.f32 %v2199_v63, %v1025_v25  ;;  %v1222_v44 = vadd.f32 %v2199_v63, %v1026_v9  ;;  %v971_v0 = vmul.f32 %v846_v60, %v1925_v2  ;;  %v972_v14 = vmul.f32 %v846_v60, %v1928_v22  ;;  %v2722_v2 = vld [vmem:[#allocation32_spill] sm:$0xff]  ;;  %v2723_v22 = vld [vmem:[#allocation33_spill] sm:$0xff] }
 0x1e1   : > { %1277 = vst [vmem:[%s2304_s28 + $0x30] sm:$0xff] %v1221_v29  ;;  %1278 = vst.msk [vmem:[%s2304_s28 + $0x38] sm:$0xff] %vm260_vm0, %v1222_v44  ;;  %v1027_v54 = vadd.f32 %v971_v0, %v747_v61  ;;  %v1028_v26 = vadd.f32 %v972_v14, %v748_v47  ;;  %v761_v61 = vld [vmem:[%s2292_s25 + $0xb0] sm:$0xff]  ;;  %v762_v47 = vld [vmem:[%s2292_s25 + $0xb8] sm:$0xff] }
 0x1e2   : > { %v851_v12 = vpop.permute.xlu1 %850  ;;  %v871_v33 = vpop.permute.xlu0 %870 }
 0x1e3   : > { %v1223_v63 = vadd.f32 %v2201_v62, %v1027_v54  ;;  %v1224_v30 = vadd.f32 %v2201_v62, %v1028_v26  ;;  %v973_v41 = vmul.f32 %v851_v12, %v2722_v2  ;;  %v974_v20 = vmul.f32 %v851_v12, %v2723_v22  ;;  %v753_v54 = vld [vmem:[%s2292_s25 + $0x70] sm:$0xff] }
 0x1e4   : > { %v981_v17 = vmul.f32 %v871_v33, %v1961_v24  ;;  %v982_v59 = vmul.f32 %v871_v33, %v1964_v19  ;;  %v765_v33 = vld [vmem:[%s2292_s25 + $0xd0] sm:$0xff] }
 0x1e5   : > { %1279 = vst [vmem:[%s2304_s28 + $0x40] sm:$0xff] %v1223_v63  ;;  %1280 = vst.msk [vmem:[%s2304_s28 + $0x48] sm:$0xff] %vm260_vm0, %v1224_v30  ;;  %v1029_v42 = vadd.f32 %v973_v41, %v749_v39  ;;  %v1030_v51 = vadd.f32 %v974_v20, %v750_v8  ;;  %v766_v63 = vld [vmem:[%s2292_s25 + $0xd8] sm:$0xff] }
 0x1e6   : > { %v1037_v36 = vadd.f32 %v981_v17, %v757_v34  ;;  %v1038_v62 = vadd.f32 %v982_v59, %v758_v16  ;;  %v856_v31 = vpop.permute.xlu1 %855  ;;  %v881_v15 = vpop.permute.xlu0 %880  ;;  %v755_v34 = vld [vmem:[%s2292_s25 + $0x80] sm:$0xff] }
 0x1e7   : > { %v1225_v24 = vadd.f32 %v2209_v46, %v1029_v42  ;;  %v1226_v19 = vadd.f32 %v2209_v46, %v1030_v51  ;;  %v975_v25 = vmul.f32 %v856_v31, %v1948_v49  ;;  %v976_v9 = vmul.f32 %v856_v31, %v1951_v11  ;;  %v769_v51 = vld [vmem:[%s2292_s25 + $0xf0] sm:$0xff] }
 0x1e8   : > { %v1233_v60 = vadd.f32 %v2222_v48, %v1037_v36  ;;  %v1234_v29 = vadd.f32 %v2222_v48, %v1038_v62  ;;  %v985_v44 = vmul.f32 %v881_v15, %v1985_v13  ;;  %v986_v0 = vmul.f32 %v881_v15, %v1988_v6  ;;  %v754_v48 = vld [vmem:[%s2292_s25 + $0x78] sm:$0xff] }
 0x1e9   : > { %1281 = vst [vmem:[%s2304_s28 + $0x50] sm:$0xff] %v1225_v24  ;;  %1282 = vst.msk [vmem:[%s2304_s28 + $0x58] sm:$0xff] %vm260_vm0, %v1226_v19  ;;  %v1031_v49 = vadd.f32 %v975_v25, %v751_v55  ;;  %v1032_v46 = vadd.f32 %v976_v9, %v752_v53  ;;  %v770_v36 = vld [vmem:[%s2292_s25 + $0xf8] sm:$0xff]  ;;  %v759_v24 = vld [vmem:[%s2292_s25 + $0xa0] sm:$0xff] }
 0x1ea   : > { %1289 = vst [vmem:[%s2304_s28 + $0x90] sm:$0xff] %v1233_v60  ;;  %1290 = vst.msk [vmem:[%s2304_s28 + $0x98] sm:$0xff] %vm260_vm0, %v1234_v29  ;;  %v1041_v11 = vadd.f32 %v985_v44, %v761_v61  ;;  %v1042_v14 = vadd.f32 %v986_v0, %v762_v47  ;;  %v861_v26 = vpop.permute.xlu1 %860  ;;  %v891_v13 = vpop.permute.xlu0 %890  ;;  %v773_v47 = vld [vmem:[%s2292_s25 + $0x110] sm:$0xff]  ;;  %v774_v60 = vld [vmem:[%s2292_s25 + $0x118] sm:$0xff] }
 0x1eb   : > { %v1227_v6 = vadd.f32 %v2213_v58, %v1031_v49  ;;  %v1228_v39 = vadd.f32 %v2213_v58, %v1032_v46  ;;  %v977_v8 = vmul.f32 %v861_v26, %v1941_v5  ;;  %v978_v12 = vmul.f32 %v861_v26, %v1944_v7  ;;  %v2724_v49 = vld [vmem:[#allocation38_spill] sm:$0xff] }
 0x1ec   : > { %v1237_v30 = vadd.f32 %v2226_v32, %v1041_v11  ;;  %v1238_v2 = vadd.f32 %v2226_v32, %v1042_v14  ;;  %v989_v41 = vmul.f32 %v891_v13, %v2005_v40  ;;  %v990_v22 = vmul.f32 %v891_v13, %v2008_v35  ;;  %v756_v32 = vld [vmem:[%s2292_s25 + $0x88] sm:$0xff]  ;;  %v763_v14 = vld [vmem:[%s2292_s25 + $0xc0] sm:$0xff] }
 0x1ed   : > { %1283 = vst [vmem:[%s2304_s28 + $0x60] sm:$0xff] %v1227_v6  ;;  %1284 = vst.msk [vmem:[%s2304_s28 + $0x68] sm:$0xff] %vm260_vm0, %v1228_v39  ;;  %v1033_v5 = vadd.f32 %v977_v8, %v753_v54  ;;  %v1034_v58 = vadd.f32 %v978_v12, %v754_v48  ;;  %v2725_v48 = vld [vmem:[#allocation57_spill] sm:$0xff]  ;;  %v2726_v6 = vld [vmem:[#allocation34_spill] sm:$0xff] }
 0x1ee   : > { %1293 = vst [vmem:[%s2304_s28 + $0xb0] sm:$0xff] %v1237_v30  ;;  %1294 = vst.msk [vmem:[%s2304_s28 + $0xb8] sm:$0xff] %vm260_vm0, %v1238_v2  ;;  %v1045_v7 = vadd.f32 %v989_v41, %v765_v33  ;;  %v1046_v20 = vadd.f32 %v990_v22, %v766_v63  ;;  %v866_v16 = vpop.permute.xlu1 %865  ;;  %v901_v40 = vpop.permute.xlu0 %900  ;;  %v2727_v8 = vld [vmem:[#allocation35_spill] sm:$0xff]  ;;  %v777_v33 = vld [vmem:[%s2292_s25 + $0x130] sm:$0xff] }
 0x1ef   : > { %v1229_v35 = vadd.f32 %v2218_v23, %v1033_v5  ;;  %v1230_v17 = vadd.f32 %v2218_v23, %v1034_v58  ;;  %v979_v59 = vmul.f32 %v866_v16, %v1969_v57  ;;  %v980_v42 = vmul.f32 %v866_v16, %v1972_v28  ;;  %v778_v63 = vld [vmem:[%s2292_s25 + $0x138] sm:$0xff]  ;;  %v2730_v58 = vld [vmem:[#allocation42_spill] sm:$0xff] }
 0x1f0   : > { %v1241_v62 = vadd.f32 %v2230_v45, %v1045_v7  ;;  %v1242_v55 = vadd.f32 %v2230_v45, %v1046_v20  ;;  %v993_v53 = vmul.f32 %v901_v40, %v2029_v21  ;;  %v994_v31 = vmul.f32 %v901_v40, %v2032_v43  ;;  %v760_v45 = vld [vmem:[%s2292_s25 + $0xa8] sm:$0xff]  ;;  %v2728_v30 = vld [vmem:[#allocation61_spill] sm:$0xff]  ;;  %v767_v40 = vld [vmem:[%s2292_s25 + $0xe0] sm:$0xff] }
 0x1f1   : > { %1285 = vst [vmem:[%s2304_s28 + $0x70] sm:$0xff] %v1229_v35  ;;  %1286 = vst.msk [vmem:[%s2304_s28 + $0x78] sm:$0xff] %vm260_vm0, %v1230_v17  ;;  %v1035_v57 = vadd.f32 %v979_v59, %v755_v34  ;;  %v1036_v23 = vadd.f32 %v980_v42, %v756_v32  ;;  %v2729_v22 = vld [vmem:[#allocation41_spill] sm:$0xff]  ;;  %v768_v35 = vld [vmem:[%s2292_s25 + $0xe8] sm:$0xff] }
 0x1f2   : > { %1297 = vst [vmem:[%s2304_s28 + $0xd0] sm:$0xff] %v1241_v62  ;;  %1298 = vst.msk [vmem:[%s2304_s28 + $0xd8] sm:$0xff] %vm260_vm0, %v1242_v55  ;;  %v1049_v28 = vadd.f32 %v993_v53, %v769_v51  ;;  %v1050_v15 = vadd.f32 %v994_v31, %v770_v36  ;;  %v876_v19 = vpop.permute.xlu1 %875  ;;  %v911_v21 = vpop.permute.xlu0 %910  ;;  %v2731_v42 = vld [vmem:[#allocation58_spill] sm:$0xff]  ;;  %v2732_v62 = vld [vmem:[#allocation36_spill] sm:$0xff] }
 0x1f3   : > { %v1231_v43 = vadd.f32 %v2220_v4, %v1035_v57  ;;  %v1232_v25 = vadd.f32 %v2220_v4, %v1036_v23  ;;  %v983_v9 = vmul.f32 %v876_v19, %v1992_v3  ;;  %v984_v61 = vmul.f32 %v876_v19, %v1995_v1  ;;  %v2733_v53 = vld [vmem:[#allocation37_spill] sm:$0xff]  ;;  %v781_v57 = vld [vmem:[%s2292_s25 + $0x150] sm:$0xff] }
 0x1f4   : > { %v1245_v29 = vadd.f32 %v2238_v50, %v1049_v28  ;;  %v1246_v44 = vadd.f32 %v2238_v50, %v1050_v15  ;;  %v997_v0 = vmul.f32 %v911_v21, %v2049_v56  ;;  %v998_v46 = vmul.f32 %v911_v21, %v2724_v49  ;;  %v764_v50 = vld [vmem:[%s2292_s25 + $0xc8] sm:$0xff]  ;;  %v782_v23 = vld [vmem:[%s2292_s25 + $0x158] sm:$0xff]  ;;  %v2736_v21 = vld [vmem:[#allocation46_spill] sm:$0xff] }
 0x1f5   : > { %1287 = vst [vmem:[%s2304_s28 + $0x80] sm:$0xff] %v1231_v43  ;;  %1288 = vst.msk [vmem:[%s2304_s28 + $0x88] sm:$0xff] %vm260_vm0, %v1232_v25  ;;  %v1039_v3 = vadd.f32 %v983_v9, %v759_v24  ;;  %v1040_v4 = vadd.f32 %v984_v61, %v760_v45  ;;  %v2734_v28 = vld [vmem:[#allocation63_spill] sm:$0xff]  ;;  %v2735_v45 = vld [vmem:[#allocation45_spill] sm:$0xff] }
 0x1f6   : > { %1301 = vst [vmem:[%s2304_s28 + $0xf0] sm:$0xff] %v1245_v29  ;;  %1302 = vst.msk [vmem:[%s2304_s28 + $0xf8] sm:$0xff] %vm260_vm0, %v1246_v44  ;;  %v1053_v1 = vadd.f32 %v997_v0, %v773_v47  ;;  %v1054_v11 = vadd.f32 %v998_v46, %v774_v60  ;;  %v886_v54 = vpop.permute.xlu1 %885  ;;  %v921_v56 = vpop.permute.xlu0 %920  ;;  %v771_v60 = vld [vmem:[%s2292_s25 + $0x100] sm:$0xff]  ;;  %v772_v29 = vld [vmem:[%s2292_s25 + $0x108] sm:$0xff] }
 0x1f7   : > { %v1235_v26 = vadd.f32 %v2725_v48, %v1039_v3  ;;  %v1236_v13 = vadd.f32 %v2725_v48, %v1040_v4  ;;  %v987_v39 = vmul.f32 %v886_v54, %v2726_v6  ;;  %v988_v12 = vmul.f32 %v886_v54, %v2727_v8  ;;  %v2737_v49 = vld [vmem:[#allocation59_spill] sm:$0xff]  ;;  %v786_v54 = vld [vmem:[%s2292_s25 + $0x178] sm:$0xff]  ;;  %v2741_v6 = vld [vmem:[#allocation50_spill] sm:$0xff] }
 0x1f8   : > { %v1249_v2 = vadd.f32 %v2728_v30, %v1053_v1  ;;  %v1250_v41 = vadd.f32 %v2728_v30, %v1054_v11  ;;  %v1001_v5 = vmul.f32 %v921_v56, %v2729_v22  ;;  %v1002_v7 = vmul.f32 %v921_v56, %v2730_v58  ;;  %v2738_v4 = vld [vmem:[#allocation39_spill] sm:$0xff]  ;;  %v2739_v11 = vld [vmem:[#allocation40_spill] sm:$0xff]  ;;  %v775_v30 = vld [vmem:[%s2292_s25 + $0x120] sm:$0xff] }
 0x1f9   : > { %1291 = vst [vmem:[%s2304_s28 + $0xa0] sm:$0xff] %v1235_v26  ;;  %1292 = vst.msk [vmem:[%s2304_s28 + $0xa8] sm:$0xff] %vm260_vm0, %v1236_v13  ;;  %v1043_v20 = vadd.f32 %v987_v39, %v763_v14  ;;  %v1044_v34 = vadd.f32 %v988_v12, %v764_v50  ;;  %v785_v50 = vld [vmem:[%s2292_s25 + $0x170] sm:$0xff]  ;;  %v2740_v26 = vld [vmem:[#allocation49_spill] sm:$0xff] }
 0x1fa   : > { %1305 = vst [vmem:[%s2304_s28 + $0x110] sm:$0xff] %v1249_v2  ;;  %1306 = vst.msk [vmem:[%s2304_s28 + $0x118] sm:$0xff] %vm260_vm0, %v1250_v41  ;;  %v1057_v32 = vadd.f32 %v1001_v5, %v777_v33  ;;  %v1058_v16 = vadd.f32 %v1002_v7, %v778_v63  ;;  %v896_v17 = vpop.permute.xlu1 %895  ;;  %v931_v59 = vpop.permute.xlu0 %930  ;;  %v2742_v22 = vld [vmem:[#allocation60_spill] sm:$0xff]  ;;  %v2743_v7 = vld [vmem:[#allocation43_spill] sm:$0xff] }
 0x1fb   : > { %v1239_v51 = vadd.f32 %v2731_v42, %v1043_v20  ;;  %v1240_v36 = vadd.f32 %v2731_v42, %v1044_v34  ;;  %v991_v55 = vmul.f32 %v896_v17, %v2732_v62  ;;  %v992_v31 = vmul.f32 %v896_v17, %v2733_v53  ;;  %v2744_v34 = vld [vmem:[#allocation44_spill] sm:$0xff] }
 0x1fc   : > { %v1253_v15 = vadd.f32 %v2734_v28, %v1057_v32  ;;  %v1254_v24 = vadd.f32 %v2734_v28, %v1058_v16  ;;  %v1005_v19 = vmul.f32 %v931_v59, %v2735_v45  ;;  %v1006_v43 = vmul.f32 %v931_v59, %v2736_v21  ;;  %v789_v16 = vld [vmem:[%s2292_s25 + $0x190] sm:$0xff]  ;;  %v2745_v59 = vld [vmem:[#allocation53_spill] sm:$0xff]  ;;  %v2747_v28 = vld [vmem:[#allocation62_spill] sm:$0xff] }
 0x1fd   : > { %1295 = vst [vmem:[%s2304_s28 + $0xc0] sm:$0xff] %v1239_v51  ;;  %1296 = vst.msk [vmem:[%s2304_s28 + $0xc8] sm:$0xff] %vm260_vm0, %v1240_v36  ;;  %v1047_v25 = vadd.f32 %v991_v55, %v767_v40  ;;  %v1048_v9 = vadd.f32 %v992_v31, %v768_v35  ;;  %v790_v40 = vld [vmem:[%s2292_s25 + $0x198] sm:$0xff]  ;;  %v2746_v51 = vld [vmem:[#allocation54_spill] sm:$0xff] }
 0x1fe   : > { %1309 = vst [vmem:[%s2304_s28 + $0x130] sm:$0xff] %v1253_v15  ;;  %1310 = vst.msk [vmem:[%s2304_s28 + $0x138] sm:$0xff] %vm260_vm0, %v1254_v24  ;;  %v1061_v61 = vadd.f32 %v1005_v19, %v781_v57  ;;  %v1062_v47 = vadd.f32 %v1006_v43, %v782_v23  ;;  %v906_v44 = vpop.permute.xlu1 %905  ;;  %v941_v0 = vpop.permute.xlu0 %940  ;;  %v780_v57 = vld [vmem:[%s2292_s25 + $0x148] sm:$0xff]  ;;  %v2749_v21 = vld [vmem:[#allocation48_spill] sm:$0xff] }
 0x1ff   : > { %v1243_v46 = vadd.f32 %v2737_v49, %v1047_v25  ;;  %v1244_v3 = vadd.f32 %v2737_v49, %v1048_v9  ;;  %v995_v1 = vmul.f32 %v906_v44, %v2738_v4  ;;  %v996_v14 = vmul.f32 %v906_v44, %v2739_v11  ;;  %v2748_v45 = vld [vmem:[#allocation47_spill] sm:$0xff] }
 0x200   : > { %v1257_v56 = vadd.f32 %v2277_v38, %v1061_v61  ;;  %v1258_v48 = vadd.f32 %v2277_v38, %v1062_v47  ;;  %v1009_v13 = vmul.f32 %v941_v0, %v2740_v26  ;;  %v1010_v39 = vmul.f32 %v941_v0, %v2741_v6  ;;  %v776_v38 = vld [vmem:[%s2292_s25 + $0x128] sm:$0xff] }
 0x201   : > { %1299 = vst [vmem:[%s2304_s28 + $0xe0] sm:$0xff] %v1243_v46  ;;  %1300 = vst.msk [vmem:[%s2304_s28 + $0xe8] sm:$0xff] %vm260_vm0, %v1244_v3  ;;  %v1051_v8 = vadd.f32 %v995_v1, %v771_v60  ;;  %v1052_v12 = vadd.f32 %v996_v14, %v772_v29  ;;  %v783_v60 = vld [vmem:[%s2292_s25 + $0x160] sm:$0xff]  ;;  %v784_v29 = vld [vmem:[%s2292_s25 + $0x168] sm:$0xff] }
 0x202   : > { %1313 = vst [vmem:[%s2304_s28 + $0x150] sm:$0xff] %v1257_v56  ;;  %1314 = vst.msk [vmem:[%s2304_s28 + $0x158] sm:$0xff] %vm260_vm0, %v1258_v48  ;;  %v1065_v33 = vadd.f32 %v1009_v13, %v785_v50  ;;  %v1066_v63 = vadd.f32 %v1010_v39, %v786_v54  ;;  %v916_v2 = vpop.permute.xlu1 %915  ;;  %v951_v41 = vpop.permute.xlu0 %950  ;;  %v2751_v3 = vld [vmem:[#allocation52_spill] sm:$0xff]  ;;  %v787_v14 = vld [vmem:[%s2292_s25 + $0x180] sm:$0xff] }
 0x203   : > { %v1247_v5 = vadd.f32 %v2742_v22, %v1051_v8  ;;  %v1248_v58 = vadd.f32 %v2742_v22, %v1052_v12  ;;  %v999_v20 = vmul.f32 %v916_v2, %v2743_v7  ;;  %v1000_v32 = vmul.f32 %v916_v2, %v2744_v34  ;;  %v788_v50 = vld [vmem:[%s2292_s25 + $0x188] sm:$0xff]  ;;  %v2753_v13 = vld [vmem:[#allocation2_spill] sm:$0xff]  ;;  %v793_v22 = vld [vmem:[%s2292_s25 + $0x1b0] sm:$0xff] }
 0x204   : > { %v1261_v35 = vadd.f32 %v2279_v18, %v1065_v33  ;;  %v1262_v17 = vadd.f32 %v2279_v18, %v1066_v63  ;;  %v1013_v42 = vmul.f32 %v951_v41, %v2745_v59  ;;  %v1014_v36 = vmul.f32 %v951_v41, %v2746_v51  ;;  %v779_v18 = vld [vmem:[%s2292_s25 + $0x140] sm:$0xff]  ;;  %v2754_v63 = vld [vmem:[#allocation56_spill] sm:$0xff] }
 0x205   : > { %1303 = vst [vmem:[%s2304_s28 + $0x100] sm:$0xff] %v1247_v5  ;;  %1304 = vst.msk [vmem:[%s2304_s28 + $0x108] sm:$0xff] %vm260_vm0, %v1248_v58  ;;  %v1055_v62 = vadd.f32 %v999_v20, %v775_v30  ;;  %v1056_v55 = vadd.f32 %v1000_v32, %v776_v38  ;;  %v2755_v38 = vld [vmem:[#allocation4_spill] sm:$0xff]  ;;  %v794_v5 = vld [vmem:[%s2292_s25 + $0x1b8] sm:$0xff] }
 0x206   : > { %1317 = vst [vmem:[%s2304_s28 + $0x170] sm:$0xff] %v1261_v35  ;;  %1318 = vst.msk [vmem:[%s2304_s28 + $0x178] sm:$0xff] %vm260_vm0, %v1262_v17  ;;  %v1069_v53 = vadd.f32 %v1013_v42, %v789_v16  ;;  %v1070_v31 = vadd.f32 %v1014_v36, %v790_v40  ;;  %v926_v23 = vpop.permute.xlu1 %925  ;;  %v2756_v58 = vld [vmem:[#allocation5_spill] sm:$0xff]  ;;  %v2757_v20 = vld [vmem:[#allocation3_spill] sm:$0xff] }
 0x207   : > { %v1251_v15 = vadd.f32 %v2747_v28, %v1055_v62  ;;  %v1252_v24 = vadd.f32 %v2747_v28, %v1056_v55  ;;  %v1003_v19 = vmul.f32 %v926_v23, %v2748_v45  ;;  %v1004_v43 = vmul.f32 %v926_v23, %v2749_v21  ;;  %v792_v32 = vld [vmem:[%s2292_s25 + $0x1a8] sm:$0xff] }
 0x208   : > { %v1265_v25 = vadd.f32 %v2294_v52, %v1069_v53  ;;  %v1266_v9 = vadd.f32 %v2294_v52, %v1070_v31  ;;  %v2750_v52 = vld [vmem:[#allocation51_spill] sm:$0xff] }
 0x209   : > { %1307 = vst [vmem:[%s2304_s28 + $0x120] sm:$0xff] %v1251_v15  ;;  %1308 = vst.msk [vmem:[%s2304_s28 + $0x128] sm:$0xff] %vm260_vm0, %v1252_v24  ;;  %v1059_v61 = vadd.f32 %v1003_v19, %v779_v18  ;;  %v1060_v47 = vadd.f32 %v1004_v43, %v780_v57 }
 0x20a   : > { %1321 = vst [vmem:[%s2304_s28 + $0x190] sm:$0xff] %v1265_v25  ;;  %1322 = vst.msk [vmem:[%s2304_s28 + $0x198] sm:$0xff] %vm260_vm0, %v1266_v9  ;;  %v936_v44 = vpop.permute.xlu1 %935 }
 0x20b   : > { %v1255_v0 = vadd.f32 %v2281_v37, %v1059_v61  ;;  %v1256_v49 = vadd.f32 %v2281_v37, %v1060_v47  ;;  %v1007_v46 = vmul.f32 %v936_v44, %v2750_v52  ;;  %v1008_v4 = vmul.f32 %v936_v44, %v2751_v3  ;;  %v2752_v37 = vld [vmem:[#allocation55_spill] sm:$0xff] }
 0x20d   : > { %1311 = vst [vmem:[%s2304_s28 + $0x140] sm:$0xff] %v1255_v0  ;;  %1312 = vst.msk [vmem:[%s2304_s28 + $0x148] sm:$0xff] %vm260_vm0, %v1256_v49  ;;  %v1063_v1 = vadd.f32 %v1007_v46, %v783_v60  ;;  %v1064_v11 = vadd.f32 %v1008_v4, %v784_v29 }
 0x20e   : > { %v946_v54 = vpop.permute.xlu1 %945 }
 0x20f   : > { %v1259_v56 = vadd.f32 %v2284_v10, %v1063_v1  ;;  %v1260_v48 = vadd.f32 %v2284_v10, %v1064_v11  ;;  %v1011_v26 = vmul.f32 %v946_v54, %v2752_v37  ;;  %v1012_v6 = vmul.f32 %v946_v54, %v2753_v13 }
 0x211   : > { %1315 = vst [vmem:[%s2304_s28 + $0x160] sm:$0xff] %v1259_v56  ;;  %1316 = vst.msk [vmem:[%s2304_s28 + $0x168] sm:$0xff] %vm260_vm0, %v1260_v48  ;;  %v1067_v39 = vadd.f32 %v1011_v26, %v787_v14  ;;  %v1068_v8 = vadd.f32 %v1012_v6, %v788_v50 }
 0x212   : > { %v956_v10 = vpop.permute.xlu1 %955 }
 0x213   : > { %v1263_v12 = vadd.f32 %v2286_v27, %v1067_v39  ;;  %v1264_v33 = vadd.f32 %v2286_v27, %v1068_v8  ;;  %v1015_v30 = vmul.f32 %v956_v10, %v2754_v63  ;;  %v1016_v2 = vmul.f32 %v956_v10, %v2755_v38  ;;  %v791_v27 = vld [vmem:[%s2292_s25 + $0x1a0] sm:$0xff] }
 0x215   : > { %1319 = vst [vmem:[%s2304_s28 + $0x180] sm:$0xff] %v1263_v12  ;;  %1320 = vst.msk [vmem:[%s2304_s28 + $0x188] sm:$0xff] %vm260_vm0, %v1264_v33  ;;  %v1071_v17 = vadd.f32 %v1015_v30, %v791_v27  ;;  %v1072_v59 = vadd.f32 %v1016_v2, %v792_v32 }
 0x217   : > { %v1213_v16 = vpop.permute.xlu1 %1212 }
 0x23b   : > { %v961_v41 = vpop.permute.xlu0 %960 }
 0x23c   : > { %v1017_v7 = vmul.f32 %v961_v41, %v2756_v58  ;;  %v1018_v34 = vmul.f32 %v961_v41, %v2757_v20 }
 0x23e   : > { %v1073_v40 = vadd.f32 %v1017_v7, %v793_v22  ;;  %v1074_v35 = vadd.f32 %v1018_v34, %v794_v5 }
 0x240   : > { %v1269_v42 = vadd.f32 %v1213_v16, %v1073_v40  ;;  %v1270_v51 = vadd.f32 %v1213_v16, %v1074_v35  ;;  %v1208_v36 = vpop.permute.xlu0 %1207 }
 0x241   : > { %v1267_v62 = vadd.f32 %v1208_v36, %v1071_v17  ;;  %v1268_v55 = vadd.f32 %v1208_v36, %v1072_v59 }
 0x242   : > { %1325 = vst [vmem:[%s2304_s28 + $0x1b0] sm:$0xff] %v1269_v42  ;;  %1326 = vst.msk [vmem:[%s2304_s28 + $0x1b8] sm:$0xff] %vm260_vm0, %v1270_v51 }
 0x243   : > { %1323 = vst [vmem:[%s2304_s28 + $0x1a0] sm:$0xff] %v1267_v62  ;;  %1324 = vst.msk [vmem:[%s2304_s28 + $0x1a8] sm:$0xff] %vm260_vm0, %v1268_v55 }
 0x244 PF: > { %s13_s12 = sadd.s32 1, %s1493_s12  }
 0x245   : > { %p10_p4 = scmp.ge.s32.totalorder %s13_s12, 6  }
 0x247   :  { %12 = sbr.rel (!%p10_p4) target bundleno = 1 (0x1), region = 66 }

</bundles_post_ra>
